<compile_context>
chip_gen: v7x
topology: tpu7x:2x2x1
jax: 0.10.0
libtpu: 0.0.40
codegen_flags: <defaults>
</compile_context>

<pallas_src>
import jax
import jax.numpy as jnp
from jax.experimental import pallas as pl
from jax.experimental.pallas import tpu as pltpu

EPS = 1e-5      # nn.BatchNorm2d default eps
LANE = 128      # TPU lane width
SUBLANE = 8     # TPU sublane width


# ------------------------------- small helpers ------------------------------- #

def _round_up(v, m):
    return (v + m - 1) // m * m


def _pad_axis(a, axis, target):
    if a.shape[axis] == target:
        return a
    widths = [(0, 0)] * a.ndim
    widths[axis] = (0, target - a.shape[axis])
    return jnp.pad(a, widths)


def _nbytes(shape, dtype):
    n = 1
    for s in shape:
        n *= int(s)
    return n * jnp.dtype(dtype).itemsize


def _compiler_params(block_bytes, scratch_bytes):
    # Double-buffered pipelined operand blocks + persistent scratch, generous slack,
    # clamped to a cross-generation budget (v7x physical VMEM is 64 MiB -> stay <=48).
    need = 2 * block_bytes + scratch_bytes
    limit = int(min(max(2 * need + (4 << 20), 16 << 20), 48 << 20))
    return pltpu.CompilerParams(dimension_semantics=("parallel",),
                                vmem_limit_bytes=limit)


# ------------------------------ in-kernel pieces ------------------------------ #

def _zero_halo(pad_ref, H, W, Wp, C, dtype):
    # Zero only the 1-pixel halo strips (plus the sublane-alignment pad columns);
    # the interior is written exactly once by the caller.
    pad_ref[:, 0:1, :, :] = jnp.zeros((1, 1, Wp, C), dtype)
    pad_ref[:, H + 1:H + 2, :, :] = jnp.zeros((1, 1, Wp, C), dtype)
    pad_ref[:, :, 0:1, :] = jnp.zeros((1, H + 2, 1, C), dtype)
    pad_ref[:, :, W + 1:Wp, :] = jnp.zeros((1, H + 2, Wp - (W + 1), C), dtype)


def _conv3x3(pad_ref, w_ref, Ho, Wo, Cin, Cout, stride):
    # 3x3 conv as 9 accumulating K=Cin MXU matmuls on offset views of the padded
    # activation (no im2col buffer, no copy passes).  Stride is folded into the reads.
    acc = jnp.zeros((Ho * Wo, Cout), jnp.float32)
    for kh in range(3):
        for kw in range(3):
            if stride == 1:
                patch = pad_ref[:, kh:kh + Ho, kw:kw + Wo, :]
            else:
                patch = pad_ref[:, pl.ds(kh, Ho, stride=stride),
                                pl.ds(kw, Wo, stride=stride), :]
            t = kh * 3 + kw
            acc = acc + jnp.dot(patch.reshape(Ho * Wo, Cin),
                                w_ref[t * Cin:(t + 1) * Cin, :],
                                preferred_element_type=jnp.float32)
    return acc


# --------------------------------- kernel A ----------------------------------- #
# Per batch sample: BN1-apply + ReLU -> conv1 (stride folded in) -> partial BN2 sums,
# plus the 1x1 strided shortcut conv when present.

def _make_kernel_a(H, W, Ho, Wo, Cin, Cout, stride, has_shortcut, mxu_dtype):
    Wp = _round_up(W + 2, SUBLANE)

    def kernel(*refs):
        if has_shortcut:
            (x_ref, s1_ref, t1_ref, w1_ref, wsc_ref,
             out1_ref, stats_ref, sc_ref, pad_ref) = refs
        else:
            (x_ref, s1_ref, t1_ref, w1_ref,
             out1_ref, stats_ref, pad_ref) = refs

        # BN1 apply (precomputed scale/shift) + ReLU, f32 math in vregs.
        x = x_ref[...]                                               # (1,H,W,Cin) f32
        a1 = jnp.maximum(x * s1_ref[...].reshape(1, 1, 1, Cin)
                         + t1_ref[...].reshape(1, 1, 1, Cin), 0.0)

        # conv1: halo-zeroed mxu_dtype scratch, interior written once, 9 MXU matmuls.
        _zero_halo(pad_ref, H, W, Wp, Cin, mxu_dtype)
        pad_ref[:, 1:H + 1, 1:W + 1, :] = a1.astype(mxu_dtype)
        acc = _conv3x3(pad_ref, w1_ref, Ho, Wo, Cin, Cout, stride)   # (Ho*Wo,Cout) f32
        out1_ref[...] = acc.reshape(1, Ho, Wo, Cout)

        # Per-tile partial sums for BN2 batch statistics (combined in the wrapper).
        stats_ref[:, 0:1, :] = jnp.sum(acc, axis=0, keepdims=True).reshape(1, 1, Cout)
        stats_ref[:, 1:2, :] = jnp.sum(acc * acc, axis=0,
                                       keepdims=True).reshape(1, 1, Cout)

        # Shortcut: strided 1x1 conv on the RAW input x.
        if has_shortcut:
            if stride == 1:
                xs = x
            else:
                xs = x_ref[:, pl.ds(0, Ho, stride=stride),
                           pl.ds(0, Wo, stride=stride), :]
            sc = jnp.dot(xs.reshape(Ho * Wo, Cin).astype(mxu_dtype), wsc_ref[...],
                         preferred_element_type=jnp.float32)
            sc_ref[...] = sc.reshape(1, Ho, Wo, Cout)

    return kernel


# --------------------------------- kernel B ----------------------------------- #
# Per batch sample: BN2-apply + ReLU -> conv2 (stride 1) -> residual add.

def _make_kernel_b(Ho, Wo, Cout, mxu_dtype):
    Wp = _round_up(Wo + 2, SUBLANE)

    def kernel(o1_ref, s2_ref, t2_ref, w2_ref, sc_ref, out_ref, pad_ref):
        a2 = jnp.maximum(o1_ref[...] * s2_ref[...].reshape(1, 1, 1, Cout)
                         + t2_ref[...].reshape(1, 1, 1, Cout), 0.0)

        _zero_halo(pad_ref, Ho, Wo, Wp, Cout, mxu_dtype)
        pad_ref[:, 1:Ho + 1, 1:Wo + 1, :] = a2.astype(mxu_dtype)
        acc = _conv3x3(pad_ref, w2_ref, Ho, Wo, Cout, Cout, 1)

        out_ref[...] = (acc + sc_ref[...].reshape(Ho * Wo, Cout)
                        ).reshape(1, Ho, Wo, Cout)

    return kernel


# ---------------------------------- wrapper ----------------------------------- #

def preact_block_forward(x_nchw, p, stride, *, mxu_dtype=jnp.bfloat16):
    """Pallas implementation of PreActBlock.forward. NCHW in / NCHW out."""
    N, Cin, H, W = x_nchw.shape
    Cout = p["w1"].shape[0]
    has_shortcut = (stride != 1) or (Cin != Cout)
    Ho = (H - 1) // stride + 1
    Wo = (W - 1) // stride + 1
    Cin_p = max(_round_up(Cin, LANE), LANE)       # lane-dense / MXU-aligned channels
    Cout_p = max(_round_up(Cout, LANE), LANE)
    Wp1 = _round_up(W + 2, SUBLANE)
    Wp2 = _round_up(Wo + 2, SUBLANE)

    x = jnp.transpose(x_nchw, (0, 2, 3, 1)).astype(jnp.float32)     # NHWC f32

    # BN1 scale/shift precomputed (training-mode batch stats, two-pass variance) so
    # the hot kernel contains no full-tensor reductions.
    mean1 = jnp.mean(x, axis=(0, 1, 2))
    var1 = jnp.var(x, axis=(0, 1, 2))
    scale1 = p["gamma1"].astype(jnp.float32) * jax.lax.rsqrt(var1 + EPS)
    shift1 = p["beta1"].astype(jnp.float32) - mean1 * scale1

    # Channel padding to 128 lanes (padded gammas/betas/weights are zero, so padded
    # lanes stay exactly zero end-to-end and are sliced off at the end).
    xp = _pad_axis(x, 3, Cin_p)
    s1 = _pad_axis(scale1, 0, Cin_p).reshape(1, Cin_p)
    t1 = _pad_axis(shift1, 0, Cin_p).reshape(1, Cin_p)
    # (O,I,3,3) -> (3,3,I,O) -> (9*Cin_p, Cout_p): row order (kh, kw, ci).
    w1m = _pad_axis(_pad_axis(jnp.transpose(p["w1"], (2, 3, 1, 0)), 2, Cin_p), 3, Cout_p)
    w1m = w1m.reshape(9 * Cin_p, Cout_p).astype(mxu_dtype)

    in_arrays = [xp, s1, t1, w1m]
    in_specs = [
        pl.BlockSpec((1, H, W, Cin_p), lambda n: (n, 0, 0, 0)),
        pl.BlockSpec((1, Cin_p), lambda n: (0, 0)),
        pl.BlockSpec((1, Cin_p), lambda n: (0, 0)),
        pl.BlockSpec((9 * Cin_p, Cout_p), lambda n: (0, 0)),
    ]
    out_shape = [
        jax.ShapeDtypeStruct((N, Ho, Wo, Cout_p), jnp.float32),     # conv1 output
        jax.ShapeDtypeStruct((N, 2, Cout_p), jnp.float32),          # BN2 partial sums
    ]
    out_specs = [
        pl.BlockSpec((1, Ho, Wo, Cout_p), lambda n: (n, 0, 0, 0)),
        pl.BlockSpec((1, 2, Cout_p), lambda n: (n, 0, 0)),
    ]

    blkA = (_nbytes((1, H, W, Cin_p), jnp.float32)
            + 2 * _nbytes((1, Cin_p), jnp.float32)
            + _nbytes((9 * Cin_p, Cout_p), mxu_dtype)
            + _nbytes((1, Ho, Wo, Cout_p), jnp.float32)
            + _nbytes((1, 2, Cout_p), jnp.float32))
    flops_a = 2 * N * Ho * Wo * 9 * Cin_p * Cout_p
    bytes_a = (xp.nbytes + s1.nbytes + t1.nbytes + w1m.nbytes
               + _nbytes((N, Ho, Wo, Cout_p), jnp.float32)
               + _nbytes((N, 2, Cout_p), jnp.float32))

    if has_shortcut:
        wscm = jnp.transpose(p["wsc"], (2, 3, 1, 0)).reshape(Cin, Cout)
        wscm = _pad_axis(_pad_axis(wscm, 0, Cin_p), 1, Cout_p).astype(mxu_dtype)
        in_arrays.append(wscm)
        in_specs.append(pl.BlockSpec((Cin_p, Cout_p), lambda n: (0, 0)))
        out_shape.append(jax.ShapeDtypeStruct((N, Ho, Wo, Cout_p), jnp.float32))
        out_specs.append(pl.BlockSpec((1, Ho, Wo, Cout_p), lambda n: (n, 0, 0, 0)))
        blkA += (_nbytes((Cin_p, Cout_p), mxu_dtype)
                 + _nbytes((1, Ho, Wo, Cout_p), jnp.float32))
        flops_a += 2 * N * Ho * Wo * Cin_p * Cout_p
        bytes_a += wscm.nbytes + _nbytes((N, Ho, Wo, Cout_p), jnp.float32)

    scrA = _nbytes((1, H + 2, Wp1, Cin_p), mxu_dtype)

    kernel_a = _make_kernel_a(H, W, Ho, Wo, Cin_p, Cout_p, stride,
                              has_shortcut, mxu_dtype)
    res = pl.pallas_call(
        kernel_a,
        grid=(N,),
        in_specs=in_specs,
        out_specs=out_specs,
        out_shape=out_shape,
        scratch_shapes=[pltpu.VMEM((1, H + 2, Wp1, Cin_p), mxu_dtype)],
        compiler_params=_compiler_params(blkA, scrA),
        cost_estimate=pl.CostEstimate(flops=int(flops_a), transcendentals=0,
                                      bytes_accessed=int(bytes_a)),
    )(*in_arrays)
    out1, stats = res[0], res[1]
    sc = res[2] if has_shortcut else xp          # identity shortcut adds raw x

    # BN2 batch statistics from the per-tile partial sums (global over N,Ho,Wo);
    # clamp the single-pass variance at zero before rsqrt.
    cnt = float(N * Ho * Wo)
    mean2 = jnp.sum(stats[:, 0, :], axis=0) / cnt
    var2 = jnp.maximum(jnp.sum(stats[:, 1, :], axis=0) / cnt - mean2 * mean2, 0.0)
    g2p = _pad_axis(p["gamma2"].astype(jnp.float32), 0, Cout_p)
    b2p = _pad_axis(p["beta2"].astype(jnp.float32), 0, Cout_p)
    scale2 = g2p * jax.lax.rsqrt(var2 + EPS)
    shift2 = b2p - mean2 * scale2
    s2 = scale2.reshape(1, Cout_p)
    t2 = shift2.reshape(1, Cout_p)

    w2m = _pad_axis(_pad_axis(jnp.transpose(p["w2"], (2, 3, 1, 0)), 2, Cout_p), 3, Cout_p)
    w2m = w2m.reshape(9 * Cout_p, Cout_p).astype(mxu_dtype)

    in_specs_b = [
        pl.BlockSpec((1, Ho, Wo, Cout_p), lambda n: (n, 0, 0, 0)),
        pl.BlockSpec((1, Cout_p), lambda n: (0, 0)),
        pl.BlockSpec((1, Cout_p), lambda n: (0, 0)),
        pl.BlockSpec((9 * Cout_p, Cout_p), lambda n: (0, 0)),
        pl.BlockSpec((1, Ho, Wo, Cout_p), lambda n: (n, 0, 0, 0)),
    ]
    blkB = (3 * _nbytes((1, Ho, Wo, Cout_p), jnp.float32)
            + 2 * _nbytes((1, Cout_p), jnp.float32)
            + _nbytes((9 * Cout_p, Cout_p), mxu_dtype))
    scrB = _nbytes((1, Ho + 2, Wp2, Cout_p), mxu_dtype)
    flops_b = 2 * N * Ho * Wo * 9 * Cout_p * Cout_p
    bytes_b = (out1.nbytes + s2.nbytes + t2.nbytes + w2m.nbytes + sc.nbytes
               + _nbytes((N, Ho, Wo, Cout_p), jnp.float32))

    kernel_b = _make_kernel_b(Ho, Wo, Cout_p, mxu_dtype)
    out = pl.pallas_call(
        kernel_b,
        grid=(N,),
        in_specs=in_specs_b,
        out_specs=pl.BlockSpec((1, Ho, Wo, Cout_p), lambda n: (n, 0, 0, 0)),
        out_shape=jax.ShapeDtypeStruct((N, Ho, Wo, Cout_p), jnp.float32),
        scratch_shapes=[pltpu.VMEM((1, Ho + 2, Wp2, Cout_p), mxu_dtype)],
        compiler_params=_compiler_params(blkB, scrB),
        cost_estimate=pl.CostEstimate(flops=int(flops_b), transcendentals=0,
                                      bytes_accessed=int(bytes_b)),
    )(out1, s2, t2, w2m, sc)

    return jnp.transpose(out[..., :Cout], (0, 3, 1, 2))             # NCHW


# ----------------------------- pure-JAX reference ----------------------------- #

def reference_forward(x_nchw, p, stride, conv_dtype=jnp.float32):
    """XLA reference. conv_dtype controls conv operand precision so the bf16-MXU
    kernel can be validated against matched-precision math."""
    x = jnp.transpose(x_nchw, (0, 2, 3, 1)).astype(jnp.float32)

    def bn_relu(v, g, b):
        mean = v.mean(axis=(0, 1, 2), keepdims=True)
        var = jnp.square(v - mean).mean(axis=(0, 1, 2), keepdims=True)
        return jnp.maximum((v - mean) / jnp.sqrt(var + EPS) * g + b, 0.0)

    def conv(v, w_oihw, s, pad):
        w = jnp.transpose(w_oihw, (2, 3, 1, 0)).astype(conv_dtype)
        return jax.lax.conv_general_dilated(
            v.astype(conv_dtype), w, (s, s), [(pad, pad), (pad, pad)],
            dimension_numbers=("NHWC", "HWIO", "NHWC"),
            preferred_element_type=jnp.float32)

    Cin = x.shape[-1]
    Cout = p["w1"].shape[0]
    a = bn_relu(x, p["gamma1"], p["beta1"])
    if stride != 1 or Cin != Cout:
        sc = conv(x, p["wsc"], stride, 0)
    else:
        sc = x
    o = conv(a, p["w1"], stride, 1)
    o = conv(bn_relu(o, p["gamma2"], p["beta2"]), p["w2"], 1, 1)
    o = o + sc
    return jnp.transpose(o, (0, 3, 1, 2))


# ----------------------------------- main -------------------------------------- #

def init_params(key, in_planes, planes, stride):
    ks = jax.random.split(key, 7)
    p = {
        "gamma1": 1.0 + 0.1 * jax.random.normal(ks[0], (in_planes,), jnp.float32),
        "beta1": 0.1 * jax.random.normal(ks[1], (in_planes,), jnp.float32),
        "w1": 0.3 * jax.random.normal(ks[2], (planes, in_planes, 3, 3), jnp.float32),
        "gamma2": 1.0 + 0.1 * jax.random.normal(ks[3], (planes,), jnp.float32),
        "beta2": 0.1 * jax.random.normal(ks[4], (planes,), jnp.float32),
        "w2": 0.3 * jax.random.normal(ks[5], (planes, planes, 3, 3), jnp.float32),
    }
    if stride != 1 or in_planes != planes:
        p["wsc"] = 0.3 * jax.random.normal(ks[6], (planes, in_planes, 1, 1), jnp.float32)
    return p


if __name__ == "__main__":
    key = jax.random.PRNGKey(0)
    kx, kp = jax.random.split(key)
    x = jax.random.normal(kx, (2, 4, 16, 16), jnp.float32)  # NCHW, like PyTorch

    # Case 1: identity shortcut (in_planes == planes, stride == 1)
    # Case 2: 1x1-conv shortcut with stride 2 and channel expansion
    cases = [(4, 4, 1), (4, 8, 2)]
    # f32-MXU path checked at tight tolerance; bf16-MXU path checked against a
    # matched-precision reference (bf16 conv operands, f32 accumulation).
    modes = [(jnp.float32, 5e-3), (jnp.bfloat16, 2e-2)]

    for (in_planes, planes, stride) in cases:
        params = init_params(kp, in_planes, planes, stride)
        for mxu_dtype, tol in modes:
            out = preact_block_forward(x, params, stride, mxu_dtype=mxu_dtype)
            out = jax.block_until_ready(out)
            ref = reference_forward(x, params, stride, conv_dtype=mxu_dtype)
            assert out.shape == ref.shape, (out.shape, ref.shape)
            if not jnp.allclose(out, ref, atol=tol, rtol=tol):
                max_err = float(jnp.max(jnp.abs(out - ref)))
                raise AssertionError(
                    f"mismatch vs reference (stride={stride}, "
                    f"dtype={jnp.dtype(mxu_dtype).name}): max abs err = {max_err}")

    print("KERNEL_OK")
</pallas_src>

<mosaic_0001>
module attributes {stable_mosaic.version = 11 : i64} {
  func.func @kernel(%arg0: i32, %arg1: memref<1x16x16x128xf32, #tpu.memory_space<vmem>>, %arg2: memref<1x128xf32, #tpu.memory_space<vmem>>, %arg3: memref<1x128xf32, #tpu.memory_space<vmem>>, %arg4: memref<1152x128xf32, #tpu.memory_space<vmem>>, %arg5: memref<1x16x16x128xf32, #tpu.memory_space<vmem>>, %arg6: memref<1x2x128xf32, #tpu.memory_space<vmem>>, %arg7: memref<1x18x24x128xf32, #tpu.memory_space<vmem>>) attributes {dimension_semantics = [#tpu.dimension_semantics<parallel>], iteration_bounds = array<i64: 2>, scalar_prefetch = 0 : i64, scratch_operands = 1 : i64, tpu.core_type = #tpu.core_type<tc>, window_params = [{transform_indices = @transform_0, window_bounds = array<i64: 1, 16, 16, 128>}, {pipeline_mode = #tpu.pipeline_mode<synchronous>, transform_indices = @transform_1, window_bounds = array<i64: 1, 128>}, {pipeline_mode = #tpu.pipeline_mode<synchronous>, transform_indices = @transform_2, window_bounds = array<i64: 1, 128>}, {pipeline_mode = #tpu.pipeline_mode<synchronous>, transform_indices = @transform_3, window_bounds = array<i64: 1152, 128>}, {transform_indices = @transform_4, window_bounds = array<i64: 1, 16, 16, 128>}, {transform_indices = @transform_5, window_bounds = array<i64: 1, 2, 128>}]} {
    %c0 = arith.constant 0 : index
    %c0_0 = arith.constant 0 : index
    %c0_1 = arith.constant 0 : index
    %c0_2 = arith.constant 0 : index
    %0 = vector.load %arg1[%c0, %c0_0, %c0_1, %c0_2] : memref<1x16x16x128xf32, #tpu.memory_space<vmem>>, vector<1x16x16x128xf32>
    %c0_3 = arith.constant 0 : index
    %c0_4 = arith.constant 0 : index
    %1 = vector.load %arg2[%c0_3, %c0_4] : memref<1x128xf32, #tpu.memory_space<vmem>>, vector<1x128xf32>
    %2 = vector.shape_cast %1 : vector<1x128xf32> to vector<1x1x1x128xf32>
    %3 = vector.broadcast %2 : vector<1x1x1x128xf32> to vector<1x16x16x128xf32>
    %4 = arith.mulf %0, %3 : vector<1x16x16x128xf32>
    %c0_5 = arith.constant 0 : index
    %c0_6 = arith.constant 0 : index
    %5 = vector.load %arg3[%c0_5, %c0_6] : memref<1x128xf32, #tpu.memory_space<vmem>>, vector<1x128xf32>
    %6 = vector.shape_cast %5 : vector<1x128xf32> to vector<1x1x1x128xf32>
    %7 = vector.broadcast %6 : vector<1x1x1x128xf32> to vector<1x16x16x128xf32>
    %8 = arith.addf %4, %7 : vector<1x16x16x128xf32>
    %cst = arith.constant 0.000000e+00 : f32
    %9 = vector.broadcast %cst : f32 to vector<1x16x16x128xf32>
    %10 = arith.maximumf %8, %9 : vector<1x16x16x128xf32>
    %cst_7 = arith.constant 0.000000e+00 : f32
    %11 = vector.broadcast %cst_7 : f32 to vector<1x1x24x128xf32>
    %c0_8 = arith.constant 0 : index
    %c0_9 = arith.constant 0 : index
    %c0_10 = arith.constant 0 : index
    %c0_11 = arith.constant 0 : index
    %12 = vector.load %arg7[%c0_8, %c0_9, %c0_10, %c0_11] : memref<1x18x24x128xf32, #tpu.memory_space<vmem>>, vector<1x1x24x128xf32>
    tpu.vector_store %arg7[%c0_8, %c0_9, %c0_10, %c0_11], %11 {strides = array<i32>} : memref<1x18x24x128xf32, #tpu.memory_space<vmem>>, vector<1x1x24x128xf32>,
    %cst_12 = arith.constant 0.000000e+00 : f32
    %13 = vector.broadcast %cst_12 : f32 to vector<1x1x24x128xf32>
    %c0_13 = arith.constant 0 : index
    %c17 = arith.constant 17 : index
    %c0_14 = arith.constant 0 : index
    %c0_15 = arith.constant 0 : index
    %14 = vector.load %arg7[%c0_13, %c17, %c0_14, %c0_15] : memref<1x18x24x128xf32, #tpu.memory_space<vmem>>, vector<1x1x24x128xf32>
    tpu.vector_store %arg7[%c0_13, %c17, %c0_14, %c0_15], %13 {strides = array<i32>} : memref<1x18x24x128xf32, #tpu.memory_space<vmem>>, vector<1x1x24x128xf32>,
    %cst_16 = arith.constant 0.000000e+00 : f32
    %15 = vector.broadcast %cst_16 : f32 to vector<1x18x1x128xf32>
    %c0_17 = arith.constant 0 : index
    %c0_18 = arith.constant 0 : index
    %c0_19 = arith.constant 0 : index
    %c0_20 = arith.constant 0 : index
    %16 = vector.load %arg7[%c0_17, %c0_18, %c0_19, %c0_20] : memref<1x18x24x128xf32, #tpu.memory_space<vmem>>, vector<1x18x1x128xf32>
    tpu.vector_store %arg7[%c0_17, %c0_18, %c0_19, %c0_20], %15 {strides = array<i32>} : memref<1x18x24x128xf32, #tpu.memory_space<vmem>>, vector<1x18x1x128xf32>,
    %cst_21 = arith.constant 0.000000e+00 : f32
    %17 = vector.broadcast %cst_21 : f32 to vector<1x18x7x128xf32>
    %c0_22 = arith.constant 0 : index
    %c0_23 = arith.constant 0 : index
    %c17_24 = arith.constant 17 : index
    %c0_25 = arith.constant 0 : index
    %18 = vector.load %arg7[%c0_22, %c0_23, %c17_24, %c0_25] : memref<1x18x24x128xf32, #tpu.memory_space<vmem>>, vector<1x18x7x128xf32>
    tpu.vector_store %arg7[%c0_22, %c0_23, %c17_24, %c0_25], %17 {strides = array<i32>} : memref<1x18x24x128xf32, #tpu.memory_space<vmem>>, vector<1x18x7x128xf32>,
    %c0_26 = arith.constant 0 : index
    %c1 = arith.constant 1 : index
    %c1_27 = arith.constant 1 : index
    %c0_28 = arith.constant 0 : index
    %19 = vector.load %arg7[%c0_26, %c1, %c1_27, %c0_28] : memref<1x18x24x128xf32, #tpu.memory_space<vmem>>, vector<1x16x16x128xf32>
    tpu.vector_store %arg7[%c0_26, %c1, %c1_27, %c0_28], %10 {strides = array<i32>} : memref<1x18x24x128xf32, #tpu.memory_space<vmem>>, vector<1x16x16x128xf32>,
    %cst_29 = arith.constant 0.000000e+00 : f32
    %20 = vector.broadcast %cst_29 : f32 to vector<256x128xf32>
    %c0_30 = arith.constant 0 : index
    %c0_31 = arith.constant 0 : index
    %c0_32 = arith.constant 0 : index
    %c0_33 = arith.constant 0 : index
    %21 = vector.load %arg7[%c0_30, %c0_31, %c0_32, %c0_33] : memref<1x18x24x128xf32, #tpu.memory_space<vmem>>, vector<1x16x16x128xf32>
    %22 = vector.shape_cast %21 : vector<1x16x16x128xf32> to vector<256x128xf32>
    %c0_34 = arith.constant 0 : index
    %c0_35 = arith.constant 0 : index
    %23 = vector.load %arg4[%c0_34, %c0_35] : memref<1152x128xf32, #tpu.memory_space<vmem>>, vector<128x128xf32>
    %cst_36 = arith.constant dense<0.000000e+00> : vector<256x128xf32>
    %24 = tpu.matmul %22, %23, %cst_36 {dimension_numbers = #tpu.dot_dimension_numbers<[1], [0], [0], [1], [0, 0, 1, 1], [], []>} : vector<256x128xf32>, vector<128x128xf32>, vector<256x128xf32> -> vector<256x128xf32>
    %25 = arith.addf %20, %24 : vector<256x128xf32>
    %c0_37 = arith.constant 0 : index
    %c0_38 = arith.constant 0 : index
    %c1_39 = arith.constant 1 : index
    %c0_40 = arith.constant 0 : index
    %26 = vector.load %arg7[%c0_37, %c0_38, %c1_39, %c0_40] : memref<1x18x24x128xf32, #tpu.memory_space<vmem>>, vector<1x16x16x128xf32>
    %27 = vector.shape_cast %26 : vector<1x16x16x128xf32> to vector<256x128xf32>
    %c128 = arith.constant 128 : index
    %c0_41 = arith.constant 0 : index
    %28 = vector.load %arg4[%c128, %c0_41] : memref<1152x128xf32, #tpu.memory_space<vmem>>, vector<128x128xf32>
    %cst_42 = arith.constant dense<0.000000e+00> : vector<256x128xf32>
    %29 = tpu.matmul %27, %28, %cst_42 {dimension_numbers = #tpu.dot_dimension_numbers<[1], [0], [0], [1], [0, 0, 1, 1], [], []>} : vector<256x128xf32>, vector<128x128xf32>, vector<256x128xf32> -> vector<256x128xf32>
    %30 = arith.addf %25, %29 : vector<256x128xf32>
    %c0_43 = arith.constant 0 : index
    %c0_44 = arith.constant 0 : index
    %c2 = arith.constant 2 : index
    %c0_45 = arith.constant 0 : index
    %31 = vector.load %arg7[%c0_43, %c0_44, %c2, %c0_45] : memref<1x18x24x128xf32, #tpu.memory_space<vmem>>, vector<1x16x16x128xf32>
    %32 = vector.shape_cast %31 : vector<1x16x16x128xf32> to vector<256x128xf32>
    %c256 = arith.constant 256 : index
    %c0_46 = arith.constant 0 : index
    %33 = vector.load %arg4[%c256, %c0_46] : memref<1152x128xf32, #tpu.memory_space<vmem>>, vector<128x128xf32>
    %cst_47 = arith.constant dense<0.000000e+00> : vector<256x128xf32>
    %34 = tpu.matmul %32, %33, %cst_47 {dimension_numbers = #tpu.dot_dimension_numbers<[1], [0], [0], [1], [0, 0, 1, 1], [], []>} : vector<256x128xf32>, vector<128x128xf32>, vector<256x128xf32> -> vector<256x128xf32>
    %35 = arith.addf %30, %34 : vector<256x128xf32>
    %c0_48 = arith.constant 0 : index
    %c1_49 = arith.constant 1 : index
    %c0_50 = arith.constant 0 : index
    %c0_51 = arith.constant 0 : index
    %36 = vector.load %arg7[%c0_48, %c1_49, %c0_50, %c0_51] : memref<1x18x24x128xf32, #tpu.memory_space<vmem>>, vector<1x16x16x128xf32>
    %37 = vector.shape_cast %36 : vector<1x16x16x128xf32> to vector<256x128xf32>
    %c384 = arith.constant 384 : index
    %c0_52 = arith.constant 0 : index
    %38 = vector.load %arg4[%c384, %c0_52] : memref<1152x128xf32, #tpu.memory_space<vmem>>, vector<128x128xf32>
    %cst_53 = arith.constant dense<0.000000e+00> : vector<256x128xf32>
    %39 = tpu.matmul %37, %38, %cst_53 {dimension_numbers = #tpu.dot_dimension_numbers<[1], [0], [0], [1], [0, 0, 1, 1], [], []>} : vector<256x128xf32>, vector<128x128xf32>, vector<256x128xf32> -> vector<256x128xf32>
    %40 = arith.addf %35, %39 : vector<256x128xf32>
    %c0_54 = arith.constant 0 : index
    %c1_55 = arith.constant 1 : index
    %c1_56 = arith.constant 1 : index
    %c0_57 = arith.constant 0 : index
    %41 = vector.load %arg7[%c0_54, %c1_55, %c1_56, %c0_57] : memref<1x18x24x128xf32, #tpu.memory_space<vmem>>, vector<1x16x16x128xf32>
    %42 = vector.shape_cast %41 : vector<1x16x16x128xf32> to vector<256x128xf32>
    %c512 = arith.constant 512 : index
    %c0_58 = arith.constant 0 : index
    %43 = vector.load %arg4[%c512, %c0_58] : memref<1152x128xf32, #tpu.memory_space<vmem>>, vector<128x128xf32>
    %cst_59 = arith.constant dense<0.000000e+00> : vector<256x128xf32>
    %44 = tpu.matmul %42, %43, %cst_59 {dimension_numbers = #tpu.dot_dimension_numbers<[1], [0], [0], [1], [0, 0, 1, 1], [], []>} : vector<256x128xf32>, vector<128x128xf32>, vector<256x128xf32> -> vector<256x128xf32>
    %45 = arith.addf %40, %44 : vector<256x128xf32>
    %c0_60 = arith.constant 0 : index
    %c1_61 = arith.constant 1 : index
    %c2_62 = arith.constant 2 : index
    %c0_63 = arith.constant 0 : index
    %46 = vector.load %arg7[%c0_60, %c1_61, %c2_62, %c0_63] : memref<1x18x24x128xf32, #tpu.memory_space<vmem>>, vector<1x16x16x128xf32>
    %47 = vector.shape_cast %46 : vector<1x16x16x128xf32> to vector<256x128xf32>
    %c640 = arith.constant 640 : index
    %c0_64 = arith.constant 0 : index
    %48 = vector.load %arg4[%c640, %c0_64] : memref<1152x128xf32, #tpu.memory_space<vmem>>, vector<128x128xf32>
    %cst_65 = arith.constant dense<0.000000e+00> : vector<256x128xf32>
    %49 = tpu.matmul %47, %48, %cst_65 {dimension_numbers = #tpu.dot_dimension_numbers<[1], [0], [0], [1], [0, 0, 1, 1], [], []>} : vector<256x128xf32>, vector<128x128xf32>, vector<256x128xf32> -> vector<256x128xf32>
    %50 = arith.addf %45, %49 : vector<256x128xf32>
    %c0_66 = arith.constant 0 : index
    %c2_67 = arith.constant 2 : index
    %c0_68 = arith.constant 0 : index
    %c0_69 = arith.constant 0 : index
    %51 = vector.load %arg7[%c0_66, %c2_67, %c0_68, %c0_69] : memref<1x18x24x128xf32, #tpu.memory_space<vmem>>, vector<1x16x16x128xf32>
    %52 = vector.shape_cast %51 : vector<1x16x16x128xf32> to vector<256x128xf32>
    %c768 = arith.constant 768 : index
    %c0_70 = arith.constant 0 : index
    %53 = vector.load %arg4[%c768, %c0_70] : memref<1152x128xf32, #tpu.memory_space<vmem>>, vector<128x128xf32>
    %cst_71 = arith.constant dense<0.000000e+00> : vector<256x128xf32>
    %54 = tpu.matmul %52, %53, %cst_71 {dimension_numbers = #tpu.dot_dimension_numbers<[1], [0], [0], [1], [0, 0, 1, 1], [], []>} : vector<256x128xf32>, vector<128x128xf32>, vector<256x128xf32> -> vector<256x128xf32>
    %55 = arith.addf %50, %54 : vector<256x128xf32>
    %c0_72 = arith.constant 0 : index
    %c2_73 = arith.constant 2 : index
    %c1_74 = arith.constant 1 : index
    %c0_75 = arith.constant 0 : index
    %56 = vector.load %arg7[%c0_72, %c2_73, %c1_74, %c0_75] : memref<1x18x24x128xf32, #tpu.memory_space<vmem>>, vector<1x16x16x128xf32>
    %57 = vector.shape_cast %56 : vector<1x16x16x128xf32> to vector<256x128xf32>
    %c896 = arith.constant 896 : index
    %c0_76 = arith.constant 0 : index
    %58 = vector.load %arg4[%c896, %c0_76] : memref<1152x128xf32, #tpu.memory_space<vmem>>, vector<128x128xf32>
    %cst_77 = arith.constant dense<0.000000e+00> : vector<256x128xf32>
    %59 = tpu.matmul %57, %58, %cst_77 {dimension_numbers = #tpu.dot_dimension_numbers<[1], [0], [0], [1], [0, 0, 1, 1], [], []>} : vector<256x128xf32>, vector<128x128xf32>, vector<256x128xf32> -> vector<256x128xf32>
    %60 = arith.addf %55, %59 : vector<256x128xf32>
    %c0_78 = arith.constant 0 : index
    %c2_79 = arith.constant 2 : index
    %c2_80 = arith.constant 2 : index
    %c0_81 = arith.constant 0 : index
    %61 = vector.load %arg7[%c0_78, %c2_79, %c2_80, %c0_81] : memref<1x18x24x128xf32, #tpu.memory_space<vmem>>, vector<1x16x16x128xf32>
    %62 = vector.shape_cast %61 : vector<1x16x16x128xf32> to vector<256x128xf32>
    %c1024 = arith.constant 1024 : index
    %c0_82 = arith.constant 0 : index
    %63 = vector.load %arg4[%c1024, %c0_82] : memref<1152x128xf32, #tpu.memory_space<vmem>>, vector<128x128xf32>
    %cst_83 = arith.constant dense<0.000000e+00> : vector<256x128xf32>
    %64 = tpu.matmul %62, %63, %cst_83 {dimension_numbers = #tpu.dot_dimension_numbers<[1], [0], [0], [1], [0, 0, 1, 1], [], []>} : vector<256x128xf32>, vector<128x128xf32>, vector<256x128xf32> -> vector<256x128xf32>
    %65 = arith.addf %60, %64 : vector<256x128xf32>
    %66 = vector.shape_cast %65 : vector<256x128xf32> to vector<1x16x16x128xf32>
    %c0_84 = arith.constant 0 : index
    %c0_85 = arith.constant 0 : index
    %c0_86 = arith.constant 0 : index
    %c0_87 = arith.constant 0 : index
    %67 = vector.load %arg5[%c0_84, %c0_85, %c0_86, %c0_87] : memref<1x16x16x128xf32, #tpu.memory_space<vmem>>, vector<1x16x16x128xf32>
    tpu.vector_store %arg5[%c0_84, %c0_85, %c0_86, %c0_87], %66 {strides = array<i32>} : memref<1x16x16x128xf32, #tpu.memory_space<vmem>>, vector<1x16x16x128xf32>,
    %cst_88 = arith.constant dense<0.000000e+00> : vector<128xf32>
    %68 = vector.multi_reduction <add>, %65, %cst_88 [0] : vector<256x128xf32> to vector<128xf32>
    %69 = vector.shape_cast %68 : vector<128xf32> to vector<1x128xf32>
    %70 = vector.shape_cast %69 : vector<1x128xf32> to vector<1x1x128xf32>
    %c0_89 = arith.constant 0 : index
    %c0_90 = arith.constant 0 : index
    %c0_91 = arith.constant 0 : index
    %71 = vector.load %arg6[%c0_89, %c0_90, %c0_91] : memref<1x2x128xf32, #tpu.memory_space<vmem>>, vector<1x1x128xf32>
    tpu.vector_store %arg6[%c0_89, %c0_90, %c0_91], %70 {strides = array<i32>} : memref<1x2x128xf32, #tpu.memory_space<vmem>>, vector<1x1x128xf32>,
    %72 = arith.mulf %65, %65 : vector<256x128xf32>
    %cst_92 = arith.constant dense<0.000000e+00> : vector<128xf32>
    %73 = vector.multi_reduction <add>, %72, %cst_92 [0] : vector<256x128xf32> to vector<128xf32>
    %74 = vector.shape_cast %73 : vector<128xf32> to vector<1x128xf32>
    %75 = vector.shape_cast %74 : vector<1x128xf32> to vector<1x1x128xf32>
    %c0_93 = arith.constant 0 : index
    %c1_94 = arith.constant 1 : index
    %c0_95 = arith.constant 0 : index
    %76 = vector.load %arg6[%c0_93, %c1_94, %c0_95] : memref<1x2x128xf32, #tpu.memory_space<vmem>>, vector<1x1x128xf32>
    tpu.vector_store %arg6[%c0_93, %c1_94, %c0_95], %75 {strides = array<i32>} : memref<1x2x128xf32, #tpu.memory_space<vmem>>, vector<1x1x128xf32>,
    return
  }
  func.func @transform_0(%arg0: i32) -> (i32, i32, i32, i32) {
    %c0_i32 = arith.constant 0 : i32
    %c0_i32_0 = arith.constant 0 : i32
    %c0_i32_1 = arith.constant 0 : i32
    %c0_i32_2 = arith.constant 0 : i32
    return %arg0, %c0_i32, %c0_i32_0, %c0_i32_1 : i32, i32, i32, i32
  }
  func.func @transform_1(%arg0: i32) -> (i32, i32) {
    %c0_i32 = arith.constant 0 : i32
    %c0_i32_0 = arith.constant 0 : i32
    %c0_i32_1 = arith.constant 0 : i32
    return %c0_i32, %c0_i32_0 : i32, i32
  }
  func.func @transform_2(%arg0: i32) -> (i32, i32) {
    %c0_i32 = arith.constant 0 : i32
    %c0_i32_0 = arith.constant 0 : i32
    %c0_i32_1 = arith.constant 0 : i32
    return %c0_i32, %c0_i32_0 : i32, i32
  }
  func.func @transform_3(%arg0: i32) -> (i32, i32) {
    %c0_i32 = arith.constant 0 : i32
    %c0_i32_0 = arith.constant 0 : i32
    %c0_i32_1 = arith.constant 0 : i32
    return %c0_i32, %c0_i32_0 : i32, i32
  }
  func.func @transform_4(%arg0: i32) -> (i32, i32, i32, i32) {
    %c0_i32 = arith.constant 0 : i32
    %c0_i32_0 = arith.constant 0 : i32
    %c0_i32_1 = arith.constant 0 : i32
    %c0_i32_2 = arith.constant 0 : i32
    return %arg0, %c0_i32, %c0_i32_0, %c0_i32_1 : i32, i32, i32, i32
  }
  func.func @transform_5(%arg0: i32) -> (i32, i32, i32) {
    %c0_i32 = arith.constant 0 : i32
    %c0_i32_0 = arith.constant 0 : i32
    %c0_i32_1 = arith.constant 0 : i32
    return %arg0, %c0_i32, %c0_i32_0 : i32, i32, i32
  }
}

</mosaic_0001>

<bundles_post_ra>
// kernel: tpu_custom_call.1
= control target key start
LH: loop header
LB: loop body
LE: loop exit
PB: predicated region body
PF: predicated region fallthrough
CT: control target
= control target key end

     0   :  { %11 = vsyncpa [#allocation4], 0  ;;  %s6494_s0 = inlined_call_operand.hbm [shape: f32[2,16,16,128], index: 0, kind: input, shape index: {}]   ;;  %s6495_s1 = inlined_call_operand.vmem [shape: f32[1,128], index: 1, kind: input, shape index: {}]   ;;  %s6496_s2 = inlined_call_operand.vmem [shape: f32[1,128], index: 2, kind: input, shape index: {}]   ;;  %s6497_s3 = inlined_call_operand.hbm [shape: f32[1152,128], index: 3, kind: input, shape index: {}]   ;;  %s6498_s4 = inlined_call_operand.hbm [shape: f32[2,16,16,128], index: 4, kind: output, shape index: {0}]   ;;  %s6499_s5 = inlined_call_operand.hbm [shape: f32[2,2,128], index: 5, kind: output, shape index: {1}]  }
   0x1   :  { %13 = vsyncpa [#allocation4 + $0x1], 0 }
   0x2   :  { %14 = vsyncpa [#allocation7], 0 }
   0x3   :  { %15 = vsyncpa [#allocation5], 0 }
   0x4   :  { %17 = vsyncpa [#allocation5 + $0x1], 0 }
   0x5   :  { %18 = vsyncpa [#allocation10], 0 }
   0x6   :  { %20 = vsyncpa [#allocation10 + $0x1], 0  ;;  %s5463_s18 = smov 0   ;;  %s5465_s19 = smov 0  }
   0x7   :  { %s5467_s20 = smov 0   ;;  %s5469_s21 = smov 0  }
   0x8 LB: > { %s5484_s22 = sadd.s32 4294967295, %s5422_s21   ;;  %s3456_s23 = sadd.s32 4294967294, %s5422_s21   ;;  %s5422_s21 = sphi %s5469_s21, %s6582_s21   ;;  %s5418_s20 = sphi %s5467_s20, %s6581_s20   ;;  %s5414_s19 = sphi %s5465_s19, %s6580_s19   ;;  %s5410_s18 = sphi %s5463_s18, %s6579_s18  }
   0x9   : > { %p46_p0 = scmp.ne.s32.totalorder %s5414_s19, %s5410_s18  ;;  %p6500_p1 = scmp.eq.s32.totalorder %s5484_s22, 0 }
   0xa   : > { %p139_p3 = scmp.eq.s32.totalorder %s3456_s23, 1  ;;  %p3457_p5 = scmp.ge.s32.totalorder %s5422_s21, 1 }
   0xb   : > { %p5493_p4 = por %p6500_p1, %p46_p0  ;;  %p172_p7 = scmp.lt.s32.totalorder %s5422_s21, 3 }
   0xc   : > { %p5498_p6 = por %p139_p3, %p46_p0  ;;  %s5424_s27 = smov [#allocation6]  }
   0xd   : > { %s6528_s24 = scalar_select %p5493_p4, 1, 0 }
   0xe   : > { %s6529_s25 = scalar_select %p5498_p6, 1, 0 }
   0xf   : > { %p5503_p8 = pnand %p3457_p5, %p172_p7  ;;  %s190_s28 = sshll.u32 %s5424_s27, 4  ;;  %s5507_s28 = int_to_ptr.vmem [resolvable:$true] %s190_s28 }
  0x10   : > { %s5519_s30 = sadd.s32 1, %s5422_s21   ;;  %s33_s6 = sadd.s32 1, %s5418_s20 }
  0x11   : > { %s6530_s26 = scalar_select %p5503_p8, 1, 0 }
  0x12   : > { %p5201_p9 = pneg %p5503_p8  ;;  %s30_s7 = ssub.s32 %s5422_s21, %s5519_s30 }
  0x13   : > { %s5262_s10 = scalar_lea.hbm %s6497_s3, 18432 }
  0x14   : > { %p5514_p11 = pnand %p5201_p9, %p6500_p1  ;;  %p5263_p12 = scmp.ne.s32.totalorder %s6497_s3, %s5262_s10 }
  0x15   : > { %p5269_p5 = scmp.lt.u32.totalorder %s5262_s10, %s6497_s3 }
  0x16   : > { %p5264_p13 = pneg %p5514_p11 }
  0x18   : > { %p5265_p0 = pnand %p5264_p13, %p5263_p12 }
  0x1a   : > { %p5266_p3 = pneg %p5265_p0 }
  0x1c   : > { %p5271_p7 = pnand %p5269_p5, %p5266_p3 }
  0x1e   : > { %5274 = shalt.err (!%p5271_p7)
}
  0x1f   : > { %s5275_s15 = scalar_lea.vmem %s5507_s28, 18432  ;;  %p5283_p2 = scmp.lt.s32.totalorder %s5507_s28, %s5507_s28 }
  0x20   : > { %p5276_p9 = scmp.ne.s32.totalorder %s5507_s28, %s5275_s15  ;;  %p5284_p6 = scmp.lt.s32.totalorder %s5275_s15, %s5275_s15 }
  0x22   : > { %p5278_p10 = pnand %p5276_p9, %p5264_p13  ;;  %p5285_p4 = por %p5284_p6, %p5283_p2 }
  0x24   : > { %p5279_p1 = pneg %p5278_p10 }
  0x26   : > { %p5286_p8 = pnand %p5285_p4, %p5279_p1 }
  0x28   : > { %5289 = shalt.err (!%p5286_p8)
}
  0x29   : > { %s5425_s16 = smov 128   ;;  %s5426_s17 = smov 8  }
  0x2a   : > { %5204 = dma.hbm_to_vmem [thread:$0]  (!%p5514_p11), %s6497_s3, 18432, %s5507_s28, [#allocation7], %s5425_s16, %s5425_s16, %s5426_s17  }
  0x2b   : > { %p31_p1 = scmp.eq.s32.totalorder %s30_s7, 0  ;;  %p40_p2 = scmp.ne.s32.totalorder %s5418_s20, %s5414_s19 }
  0x2c   : > { %p41_p4 = scmp.eq.s32.totalorder %s5422_s21, 0  ;;  %p5217_p6 = scmp.lt.s32.totalorder %s5422_s21, 2 }
  0x2d   : > { %s5553_s8 = scalar_select %p31_p1, %s5418_s20, %s33_s6  }
  0x2e   : > { %p42_p8 = por %p41_p4, %p40_p2  ;;  %p6532_p10 = scmp.eq.s32.totalorder %s5484_s22, 1 }
  0x2f   : > { %s204_s29 = sand.u32 1, %s5418_s20   ;;  %s3477_s10 = sshll.u32 %s5422_s21, 12 }
  0x30   : > { %p5557_p12 = por %p6532_p10, %p40_p2  ;;  %s3460_s11 = sshll.u32 %s204_s29, 8 }
  0x31   : > { %s5566_s14 = scalar_lea.hbm %s6494_s0, %s3477_s10  ;;  %s208_s28 = scalar_lea.vmem [#allocation3], %s3460_s11 }
  0x32   : > { %s215_s6 = sshll.u32 %s208_s28, 4  ;;  %p5568_p11 = pnand %p5217_p6, %p42_p8  ;;  %s5572_s6 = int_to_ptr.vmem [resolvable:$true] %s215_s6 }
  0x33   : > { %s5574_s15 = scalar_lea.sflag [#allocation4], %s204_s29  ;;  %s5290_s23 = scalar_lea.hbm %s5566_s14, 4096 }
  0x34   : > { %p5291_p13 = scmp.ne.s32.totalorder %s5566_s14, %s5290_s23  ;;  %p5292_p0 = pneg %p5568_p11 }
  0x35   : > { %s5295_s11 = scalar_lea.hbm %s6494_s0, 8192  ;;  %p5296_p7 = scmp.lt.u32.totalorder %s5566_s14, %s6494_s0 }
  0x36   : > { %p5293_p3 = pnand %p5292_p0, %p5291_p13  ;;  %p5297_p9 = scmp.lt.u32.totalorder %s5295_s11, %s5290_s23 }
  0x37   : > { %p5299_p2 = scmp.lt.u32.totalorder %s5290_s23, %s5566_s14 }
  0x38   : > { %p5294_p5 = pneg %p5293_p3  ;;  %p5298_p1 = por %p5297_p9, %p5296_p7 }
  0x3a   : > { %p5300_p4 = por %p5299_p2, %p5298_p1 }
  0x3c   : > { %p5301_p6 = pnand %p5300_p4, %p5294_p5 }
  0x3e   : > { %5304 = shalt.err (!%p5301_p6)
}
  0x3f   : > { %s5305_s29 = scalar_lea.vmem %s5572_s6, 4096  ;;  %s5427_s28 = smov [#allocation3]  }
  0x40   : > { %p5306_p8 = scmp.ne.s32.totalorder %s5572_s6, %s5305_s29  ;;  %s5310_s27 = sshll.u32 %s5427_s28, 4  ;;  %s5311_s27 = int_to_ptr.vmem [resolvable:$false] %s5310_s27 }
  0x41   : > { %s5312_s10 = scalar_lea.vmem %s5311_s27, 8192  ;;  %p5313_p3 = scmp.lt.s32.totalorder %s5572_s6, %s5311_s27 }
  0x42   : > { %p5308_p10 = pnand %p5306_p8, %p5292_p0  ;;  %p5314_p7 = scmp.lt.s32.totalorder %s5312_s10, %s5305_s29 }
  0x44   : > { %p5309_p13 = pneg %p5308_p10  ;;  %p5315_p9 = por %p5314_p7, %p5313_p3 }
  0x46   : > { %p5316_p1 = pnand %p5315_p9, %p5309_p13 }
  0x48   : > { %5319 = shalt.err (!%p5316_p1)
}
  0x49   : > { %5208 = dma.hbm_to_vmem [thread:$0]  (!%p5568_p11), %s5566_s14, 4096, %s5572_s6, %s5574_s15, %s5425_s16, %s5425_s16, %s5426_s17  }
  0x4a   : > { %p6535_p0 = scmp.ne.s32.totalorder %s6530_s26, 0 }
  0x4c   : > { %227 = sbr.rel (%p6535_p0) target bundleno = 669 (0x29d), region = 36 }
  0x53   : > { %s5608_s23 = sand.u32 1, %s5414_s19   ;;  %p6536_p5 = scmp.ne.s32.totalorder %s6528_s24, 0 }
  0x54   : > { %s3464_s11 = sshll.u32 %s5608_s23, 8  ;;  %s230_s12 = scalar_lea.sflag [#allocation4], %s5608_s23 }
  0x55   : > { %s5614_s7 = scalar_lea.vmem [#allocation3], %s3464_s11 }
  0x56   : > { %5393 = dma.done.wait (%p6536_p5), %s230_s12, 4096  }
  0x57   : > { %5395 = vsyncadd (%p6536_p5), %s230_s12, 4294963200  ;;  %p6537_p11 = scmp.eq.s32.totalorder %s5484_s22, 0 }
  0x59   : > { %5397 = dma.done.wait (%p6537_p11), [#allocation7], 18432   ;;  %p6538_p2 = pmov %p6537_p11 }
  0x5a   : > { %v5428_v0 = vmov 0.0   ;;  %v567_v1 = vld [vmem:[#allocation6 + $0x80] sm:$0xff]  ;;  %v568_v2 = vld [vmem:[#allocation6 + $0x88] sm:$0xff]  ;;  %v569_v6 = vld [vmem:[#allocation6 + $0x90] sm:$0xff]  ;;  %s6373_s14 = scalar_lea.vmem [#allocation8], %s3464_s11  ;;  %s3478_s6 = sshll.u32 %s5484_s22, 12 }
  0x5b   : > { %5399 = vsyncadd (%p6538_p2), [#allocation7], 4294948864  ;;  %411 = vst [vmem:[#allocation2] sm:$0xff] %v5428_v0  ;;  %v1675_v3 = vld [vmem:[#allocation6 + $0x200] sm:$0xff]  ;;  %v4631_v4 = vpack.c.bf16 %v568_v2, %v567_v1  ;;  %v1676_v5 = vld [vmem:[#allocation6 + $0x208] sm:$0xff]  ;;  %s3328_s15 = sshll.u32 %s6373_s14, 4  ;;  %s6415_s28 = scalar_lea.hbm %s6498_s4, %s3478_s6  ;;  %s6417_s15 = int_to_ptr.vmem [resolvable:$true] %s3328_s15 }
  0x5c   : > { %412 = vst [vmem:[#allocation2 + $0x8] sm:$0xff] %v5428_v0  ;;  %413 = vst [vmem:[#allocation2 + $0x10] sm:$0xff] %v5428_v0  ;;  %v570_v7 = vld [vmem:[#allocation6 + $0x98] sm:$0xff]  ;;  %v5666_v8 = vpack.c.bf16 %v1676_v5, %v1675_v3  ;;  %v1677_v10 = vld [vmem:[#allocation6 + $0x210] sm:$0xff]  ;;  %s3310_s27 = scalar_lea.sflag [#allocation5], %s5608_s23  ;;  %s5320_s10 = scalar_lea.vmem %s6417_s15, 4096 }
  0x5d   : > { %415 = vst [vmem:[#allocation2 + $0x198] sm:$0xff] %v5428_v0  ;;  %416 = vst [vmem:[#allocation2 + $0x1a0] sm:$0xff] %v5428_v0  ;;  %v4635_v9 = vpack.c.bf16 %v570_v7, %v569_v6  ;;  %v1678_v11 = vld [vmem:[#allocation6 + $0x218] sm:$0xff]  ;;  %v571_v12 = vld [vmem:[#allocation6 + $0xa0] sm:$0xff]  ;;  %4632 = vmatprep.subr.bf16.mxu1 %v4631_v4  ;;  %p5321_p4 = scmp.ne.s32.totalorder %s6417_s15, %s5320_s10  ;;  %s5429_s11 = smov [#allocation8]  }
  0x5e   : > { %417 = vst [vmem:[#allocation2 + $0x1a8] sm:$0xff] %v5428_v0  ;;  %419 = vst [vmem:[#allocation2 + $0x18] sm:$0x1] %v5428_v0  ;;  %v5668_v13 = vpack.c.bf16 %v1678_v11, %v1677_v10  ;;  %v572_v14 = vld [vmem:[#allocation6 + $0xa8] sm:$0xff]  ;;  %v1679_v15 = vld [vmem:[#allocation6 + $0x220] sm:$0xff]  ;;  %4760 = vmatprep.subr.bf16.mxu0 %v5666_v8  ;;  %4634 = vmatpush3.bf16.msra.mxu1 %v4631_v4  ;;  %s5324_s12 = sshll.u32 %s5429_s11, 4  ;;  %s5325_s12 = int_to_ptr.vmem [resolvable:$false] %s5324_s12 }
  0x5f   : > { %420 = vst [vmem:[#allocation2 + $0x30] sm:$0x1] %v5428_v0  ;;  %421 = vst [vmem:[#allocation2 + $0x48] sm:$0x1] %v5428_v0  ;;  %v1680_v16 = vld [vmem:[#allocation6 + $0x228] sm:$0xff]  ;;  %4762 = vmatpush3.bf16.msra.mxu0 %v5666_v8  ;;  %4636 = vmatprep.subr.bf16.mxu1 %v4635_v9  ;;  %v4639_v17 = vpack.c.bf16 %v572_v14, %v571_v12  ;;  %v573_v19 = vld [vmem:[#allocation6 + $0xb0] sm:$0xff]  ;;  %p5322_p6 = pnand %p5321_p4, %p5557_p12  ;;  %p5327_p10 = scmp.lt.s32.totalorder %s6417_s15, %s5325_s12 }
  0x60   : > { %422 = vst [vmem:[#allocation2 + $0x60] sm:$0x1] %v5428_v0  ;;  %423 = vst [vmem:[#allocation2 + $0x78] sm:$0x1] %v5428_v0  ;;  %4764 = vmatprep.subr.bf16.mxu0 %v5668_v13  ;;  %v5673_v18 = vpack.c.bf16 %v1680_v16, %v1679_v15  ;;  %v574_v20 = vld [vmem:[#allocation6 + $0xb8] sm:$0xff]  ;;  %v1681_v21 = vld [vmem:[#allocation6 + $0x230] sm:$0xff] }
  0x61   : > { %424 = vst [vmem:[#allocation2 + $0x90] sm:$0x1] %v5428_v0  ;;  %425 = vst [vmem:[#allocation2 + $0xa8] sm:$0x1] %v5428_v0  ;;  %v1682_v22 = vld [vmem:[#allocation6 + $0x238] sm:$0xff]  ;;  %v4643_v23 = vpack.c.bf16 %v574_v20, %v573_v19  ;;  %v575_v24 = vld [vmem:[#allocation6 + $0xc0] sm:$0xff]  ;;  %p5323_p8 = pneg %p5322_p6 }
  0x62   : > { %426 = vst [vmem:[#allocation2 + $0xc0] sm:$0x1] %v5428_v0  ;;  %427 = vst [vmem:[#allocation2 + $0xd8] sm:$0x1] %v5428_v0  ;;  %4638 = vmatpush3.bf16.msra.mxu1 %v4635_v9  ;;  %v576_v25 = vld [vmem:[#allocation6 + $0xc8] sm:$0xff]  ;;  %v5677_v26 = vpack.c.bf16 %v1682_v22, %v1681_v21  ;;  %v1683_v27 = vld [vmem:[#allocation6 + $0x240] sm:$0xff] }
  0x63   : > { %428 = vst [vmem:[#allocation2 + $0xf0] sm:$0x1] %v5428_v0  ;;  %429 = vst [vmem:[#allocation2 + $0x108] sm:$0x1] %v5428_v0  ;;  %4766 = vmatpush3.bf16.msra.mxu0 %v5668_v13  ;;  %4640 = vmatprep.subr.bf16.mxu1 %v4639_v17  ;;  %v1684_v28 = vld [vmem:[#allocation6 + $0x248] sm:$0xff]  ;;  %v535_v29 = vld [vmem:[#allocation2 + $0x1] sm:$0xff]  ;;  %v4647_v34 = vpack.c.bf16 %v576_v25, %v575_v24 }
  0x64   : > { %430 = vst [vmem:[#allocation2 + $0x120] sm:$0x1] %v5428_v0  ;;  %431 = vst [vmem:[#allocation2 + $0x138] sm:$0x1] %v5428_v0  ;;  %4768 = vmatprep.subr.bf16.mxu0 %v5673_v18  ;;  %3943 = vmatprep.mubr.f32.mxu1 %v535_v29  ;;  %v269_v30 = vld [vmem:[%s5614_s7] sm:$0xff]  ;;  %v577_v35 = vld [vmem:[#allocation6 + $0xd0] sm:$0xff]  ;;  %v5694_v37 = vpack.c.bf16 %v1684_v28, %v1683_v27 }
  0x65   : > { %432 = vst [vmem:[#allocation2 + $0x150] sm:$0x1] %v5428_v0  ;;  %433 = vst [vmem:[#allocation2 + $0x168] sm:$0x1] %v5428_v0  ;;  %v5683_v31 = vld [vmem:[%s6495_s1] ss:$0 sm:$0xff] }
  0x66   : > { %434 = vst [vmem:[#allocation2 + $0x180] sm:$0x1] %v5428_v0  ;;  %437 = vst [vmem:[#allocation2 + $0x29] sm:$0x7f] %v5428_v0  ;;  %v5688_v32 = vld [vmem:[%s6496_s2] ss:$0 sm:$0xff]  ;;  %4642 = vmatpush3.bf16.msra.mxu1 %v4639_v17  ;;  %v308_v33 = vmul.f32 %v5683_v31, %v269_v30 }
  0x67   : > { %438 = vst [vmem:[#allocation2 + $0x41] sm:$0x7f] %v5428_v0  ;;  %439 = vst [vmem:[#allocation2 + $0x59] sm:$0x7f] %v5428_v0  ;;  %4770 = vmatpush3.bf16.msra.mxu0 %v5673_v18  ;;  %4644 = vmatprep.subr.bf16.mxu1 %v4643_v23  ;;  %v270_v36 = vld [vmem:[%s5614_s7 + $0x8] sm:$0xff]  ;;  %v578_v38 = vld [vmem:[#allocation6 + $0xd8] sm:$0xff] }
  0x68   : > { %440 = vst [vmem:[#allocation2 + $0x71] sm:$0x7f] %v5428_v0  ;;  %441 = vst [vmem:[#allocation2 + $0x89] sm:$0x7f] %v5428_v0  ;;  %4772 = vmatprep.subr.bf16.mxu0 %v5677_v26  ;;  %v347_v39 = vadd.f32 %v5688_v32, %v308_v33  ;;  %v309_v40 = vmul.f32 %v5683_v31, %v270_v36  ;;  %v271_v41 = vld [vmem:[%s5614_s7 + $0x10] sm:$0xff]  ;;  %v272_v42 = vld [vmem:[%s5614_s7 + $0x18] sm:$0xff]  ;;  %v4651_v52 = vpack.c.bf16 %v578_v38, %v577_v35 }
  0x69   : > { %442 = vst [vmem:[#allocation2 + $0xa1] sm:$0x7f] %v5428_v0  ;;  %443 = vst [vmem:[#allocation2 + $0xb9] sm:$0x7f] %v5428_v0  ;;  %v1685_v43 = vld [vmem:[#allocation6 + $0x250] sm:$0xff]  ;;  %v1686_v44 = vld [vmem:[#allocation6 + $0x258] sm:$0xff]  ;;  %v310_v45 = vmul.f32 %v5683_v31, %v271_v41  ;;  %v311_v46 = vmul.f32 %v5683_v31, %v272_v42 }
  0x6a   : > { %444 = vst [vmem:[#allocation2 + $0xd1] sm:$0x7f] %v5428_v0  ;;  %445 = vst [vmem:[#allocation2 + $0xe9] sm:$0x7f] %v5428_v0  ;;  %v273_v47 = vld [vmem:[%s5614_s7 + $0x20] sm:$0xff]  ;;  %4646 = vmatpush3.bf16.msra.mxu1 %v4643_v23  ;;  %v5703_v48 = vmax.f32 %v347_v39, 0.0  ;;  %v348_v49 = vadd.f32 %v5688_v32, %v309_v40  ;;  %v5714_v57 = vpack.c.bf16 %v1686_v44, %v1685_v43 }
  0x6b   : > { %446 = vst [vmem:[#allocation2 + $0x101] sm:$0x7f] %v5428_v0  ;;  %447 = vst [vmem:[#allocation2 + $0x119] sm:$0x7f] %v5428_v0  ;;  %v312_v50 = vmul.f32 %v5683_v31, %v273_v47  ;;  %v274_v51 = vld [vmem:[%s5614_s7 + $0x28] sm:$0xff]  ;;  %4774 = vmatpush3.bf16.msra.mxu0 %v5677_v26  ;;  %4648 = vmatprep.subr.bf16.mxu1 %v4647_v34  ;;  %v349_v53 = vadd.f32 %v5688_v32, %v310_v45  ;;  %v275_v55 = vld [vmem:[%s5614_s7 + $0x30] sm:$0xff] }
  0x6c   : > { %448 = vst [vmem:[#allocation2 + $0x131] sm:$0x7f] %v5428_v0  ;;  %449 = vst [vmem:[#allocation2 + $0x149] sm:$0x7f] %v5428_v0  ;;  %v350_v54 = vadd.f32 %v5688_v32, %v311_v46  ;;  %v276_v56 = vld [vmem:[%s5614_s7 + $0x38] sm:$0xff]  ;;  %4776 = vmatprep.subr.bf16.mxu0 %v5694_v37  ;;  %v579_v58 = vld [vmem:[#allocation6 + $0xe0] sm:$0xff]  ;;  %4263 = vmatprep.mubr.f32.mxu0 %v5703_v48  ;;  %v313_v62 = vmul.f32 %v5683_v31, %v274_v51 }
  0x6d   : > { %450 = vst [vmem:[#allocation2 + $0x161] sm:$0x7f] %v5428_v0  ;;  %451 = vst [vmem:[#allocation2 + $0x179] sm:$0x7f] %v5428_v0  ;;  %v580_v59 = vld [vmem:[#allocation6 + $0xe8] sm:$0xff]  ;;  %v5718_v60 = vmax.f32 %v348_v49, 0.0  ;;  %v351_v61 = vadd.f32 %v5688_v32, %v312_v50  ;;  %v314_v5 = vmul.f32 %v5683_v31, %v275_v55  ;;  %v315_v6 = vmul.f32 %v5683_v31, %v276_v56 }
  0x6e   : > { %452 = vst [vmem:[#allocation2 + $0x191] sm:$0x7f] %v5428_v0  ;;  %418 = vst [vmem:[#allocation2] sm:$0x1] %v5428_v0  ;;  %v277_v63 = vld [vmem:[%s5614_s7 + $0x40] sm:$0xff]  ;;  %v1688_v2 = vld [vmem:[#allocation6 + $0x268] sm:$0xff]  ;;  %4650 = vmatpush3.bf16.msra.mxu1 %v4647_v34  ;;  %v352_v10 = vadd.f32 %v5688_v32, %v313_v62  ;;  %v4655_v14 = vpack.c.bf16 %v580_v59, %v579_v58 }
  0x6f   : > { %435 = vst [vmem:[#allocation2 + $0x198] sm:$0x1] %v5428_v0  ;;  %436 = vst [vmem:[#allocation2 + $0x11] sm:$0x7f] %v5428_v0  ;;  %v1687_v1 = vld [vmem:[#allocation6 + $0x260] sm:$0xff]  ;;  %v5723_v3 = vmax.f32 %v349_v53, 0.0  ;;  %v316_v11 = vmul.f32 %v5683_v31, %v277_v63  ;;  %4778 = vmatpush3.bf16.msra.mxu0 %v5694_v37  ;;  %4652 = vmatprep.subr.bf16.mxu1 %v4651_v52  ;;  %v353_v15 = vadd.f32 %v5688_v32, %v314_v5 }
  0x70   : > { %453 = vst [vmem:[#allocation2 + $0x1a9] sm:$0x7f] %v5428_v0  ;;  %6539 = vst [vmem:[#allocation15_spill] sm:$0xff] %v5677_v26  ;;  %v5725_v4 = vmax.f32 %v350_v54, 0.0  ;;  %v278_v7 = vld [vmem:[%s5614_s7 + $0x48] sm:$0xff]  ;;  %v5731_v9 = vmax.f32 %v351_v61, 0.0  ;;  %v354_v16 = vadd.f32 %v5688_v32, %v315_v6  ;;  %4780 = vmatprep.subr.bf16.mxu0 %v5714_v57  ;;  %v5743_v19 = vpack.c.bf16 %v1688_v2, %v1687_v1 }
  0x71   : > { %6540 = vst [vmem:[#allocation16_spill] sm:$0xff] %v5694_v37  ;;  %6541 = vst [vmem:[#allocation17_spill] sm:$0xff] %v5714_v57  ;;  %v279_v12 = vld [vmem:[%s5614_s7 + $0x50] sm:$0xff]  ;;  %v280_v17 = vld [vmem:[%s5614_s7 + $0x58] sm:$0xff]  ;;  %v5746_v22 = vmax.f32 %v352_v10, 0.0  ;;  %v355_v23 = vadd.f32 %v5688_v32, %v316_v11  ;;  %v317_v24 = vmul.f32 %v5683_v31, %v278_v7  ;;  %v5751_v29 = vmax.f32 %v353_v15, 0.0 }
  0x72   : > { %455 = vst [vmem:[#allocation2 + $0x19] sm:$0xff] %v5703_v48  ;;  %456 = vst [vmem:[#allocation2 + $0x21] sm:$0xff] %v5718_v60  ;;  %v581_v20 = vld [vmem:[#allocation6 + $0xf0] sm:$0xff]  ;;  %v582_v21 = vld [vmem:[#allocation6 + $0xf8] sm:$0xff]  ;;  %v5753_v30 = vmax.f32 %v354_v16, 0.0  ;;  %v318_v33 = vmul.f32 %v5683_v31, %v279_v12  ;;  %v319_v34 = vmul.f32 %v5683_v31, %v280_v17  ;;  %4654 = vmatpush3.bf16.msra.mxu1 %v4651_v52 }
  0x73   : > { %457 = vst [vmem:[#allocation2 + $0x31] sm:$0xff] %v5723_v3  ;;  %458 = vst [vmem:[#allocation2 + $0x39] sm:$0xff] %v5725_v4  ;;  %v281_v25 = vld [vmem:[%s5614_s7 + $0x60] sm:$0xff]  ;;  %v1689_v27 = vld [vmem:[#allocation6 + $0x270] sm:$0xff]  ;;  %v5759_v36 = vmax.f32 %v355_v23, 0.0  ;;  %v356_v38 = vadd.f32 %v5688_v32, %v317_v24  ;;  %4782 = vmatpush3.bf16.msra.mxu0 %v5714_v57  ;;  %4656 = vmatprep.subr.bf16.mxu1 %v4655_v14  ;;  %v4659_v42 = vpack.c.bf16 %v582_v21, %v581_v20 }
  0x74   : > { %6542 = vst [vmem:[#allocation18_spill] sm:$0xff] %v5743_v19  ;;  %459 = vst [vmem:[#allocation2 + $0x49] sm:$0xff] %v5731_v9  ;;  %v1690_v28 = vld [vmem:[#allocation6 + $0x278] sm:$0xff]  ;;  %v282_v35 = vld [vmem:[%s5614_s7 + $0x68] sm:$0xff]  ;;  %v320_v39 = vmul.f32 %v5683_v31, %v281_v25  ;;  %v357_v45 = vadd.f32 %v5688_v32, %v318_v33  ;;  %v358_v46 = vadd.f32 %v5688_v32, %v319_v34  ;;  %4784 = vmatprep.subr.bf16.mxu0 %v5743_v19 }
  0x75   : > { %460 = vst [vmem:[#allocation2 + $0x51] sm:$0xff] %v5746_v22  ;;  %v283_v40 = vld [vmem:[%s5614_s7 + $0x70] sm:$0xff]  ;;  %v284_v41 = vld [vmem:[%s5614_s7 + $0x78] sm:$0xff]  ;;  %v519_v43 = vld [vmem:[#allocation6] sm:$0xff]  ;;  %v5771_v47 = vpack.c.bf16 %v1690_v28, %v1689_v27  ;;  %v5774_v51 = vmax.f32 %v356_v38, 0.0  ;;  %v321_v53 = vmul.f32 %v5683_v31, %v282_v35 }
  0x76   : > { %v520_v44 = vld [vmem:[#allocation6 + $0x8] sm:$0xff]  ;;  %461 = vst [vmem:[#allocation2 + $0x61] sm:$0xff] %v5751_v29  ;;  %462 = vst [vmem:[#allocation2 + $0x69] sm:$0xff] %v5753_v30  ;;  %v1980_v49 = vld [vmem:[#allocation6 + $0x280] sm:$0xff]  ;;  %v359_v52 = vadd.f32 %v5688_v32, %v320_v39  ;;  %v5778_v54 = vmax.f32 %v357_v45, 0.0  ;;  %v5780_v55 = vmax.f32 %v358_v46, 0.0  ;;  %v322_v56 = vmul.f32 %v5683_v31, %v283_v40  ;;  %4658 = vmatpush3.bf16.msra.mxu1 %v4655_v14 }
  0x77   : > { %6543 = vst [vmem:[#allocation19_spill] sm:$0xff] %v5771_v47  ;;  %v1981_v50 = vld [vmem:[#allocation6 + $0x288] sm:$0xff]  ;;  %463 = vst [vmem:[#allocation2 + $0x79] sm:$0xff] %v5759_v36  ;;  %v323_v58 = vmul.f32 %v5683_v31, %v284_v41  ;;  %v285_v59 = vld [vmem:[%s5614_s7 + $0x80] sm:$0xff]  ;;  %v4663_v62 = vpack.c.bf16 %v520_v44, %v519_v43  ;;  %v360_v5 = vadd.f32 %v5688_v32, %v321_v53  ;;  %4786 = vmatpush3.bf16.msra.mxu0 %v5743_v19 }
  0x78   : > { %v286_v61 = vld [vmem:[%s5614_s7 + $0x88] sm:$0xff]  ;;  %v1982_v63 = vld [vmem:[#allocation6 + $0x290] sm:$0xff]  ;;  %v1983_v1 = vld [vmem:[#allocation6 + $0x298] sm:$0xff]  ;;  %464 = vst [vmem:[#allocation2 + $0x81] sm:$0xff] %v5774_v51  ;;  %v5787_v2 = vmax.f32 %v359_v52, 0.0  ;;  %4660 = vmatprep.subr.bf16.mxu1 %v4659_v42  ;;  %v4791_v7 = vpack.c.bf16 %v1981_v50, %v1980_v49  ;;  %v361_v12 = vadd.f32 %v5688_v32, %v322_v56  ;;  %4788 = vmatprep.subr.bf16.mxu0 %v5771_v47 }
  0x79   : > { %v287_v6 = vld [vmem:[%s5614_s7 + $0x90] sm:$0xff]  ;;  %v522_v11 = vld [vmem:[#allocation6 + $0x18] sm:$0xff]  ;;  %465 = vst [vmem:[#allocation2 + $0x91] sm:$0xff] %v5778_v54  ;;  %466 = vst [vmem:[#allocation2 + $0x99] sm:$0xff] %v5780_v55  ;;  %v362_v14 = vadd.f32 %v5688_v32, %v323_v58  ;;  %v5799_v16 = vmax.f32 %v360_v5, 0.0  ;;  %v324_v17 = vmul.f32 %v5683_v31, %v285_v59  ;;  %v325_v20 = vmul.f32 %v5683_v31, %v286_v61 }
  0x7a   : > { %v521_v10 = vld [vmem:[#allocation6 + $0x10] sm:$0xff]  ;;  %v288_v15 = vld [vmem:[%s5614_s7 + $0x98] sm:$0xff]  ;;  %467 = vst [vmem:[#allocation2 + $0xa9] sm:$0xff] %v5787_v2  ;;  %v326_v21 = vmul.f32 %v5683_v31, %v287_v6  ;;  %v289_v23 = vld [vmem:[%s5614_s7 + $0xa0] sm:$0xff]  ;;  %v5805_v24 = vpack.c.bf16 %v1983_v1, %v1982_v63  ;;  %v5807_v25 = vmax.f32 %v361_v12, 0.0  ;;  %4662 = vmatpush3.bf16.msra.mxu1 %v4659_v42 }
  0x7b   : > { %v5809_v27 = vmax.f32 %v362_v14, 0.0  ;;  %v327_v28 = vmul.f32 %v5683_v31, %v288_v15  ;;  %v290_v33 = vld [vmem:[%s5614_s7 + $0xa8] sm:$0xff]  ;;  %v536_v34 = vld [vmem:[#allocation2 + $0x9] sm:$0xff]  ;;  %v5813_v35 = vpack.c.bf16 %v522_v11, %v521_v10  ;;  %468 = vst [vmem:[#allocation2 + $0xb1] sm:$0xff] %v5799_v16  ;;  %v5817_v38 = vadd.f32 %v5688_v32, %v324_v17  ;;  %v291_v41 = vld [vmem:[%s5614_s7 + $0xb0] sm:$0xff]  ;;  %4790 = vmatpush3.bf16.msra.mxu0 %v5771_v47 }
  0x7c   : > { %v5820_v39 = vadd.f32 %v5688_v32, %v325_v20  ;;  %v5823_v40 = vadd.f32 %v5688_v32, %v326_v21  ;;  %4664 = vmatprep.subr.bf16.mxu1 %v4663_v62  ;;  %v1984_v42 = vld [vmem:[#allocation6 + $0x2a0] sm:$0xff]  ;;  %v1985_v43 = vld [vmem:[#allocation6 + $0x2a8] sm:$0xff]  ;;  %469 = vst [vmem:[#allocation2 + $0xc1] sm:$0xff] %v5807_v25  ;;  %v328_v45 = vmul.f32 %v5683_v31, %v289_v23  ;;  %v292_v49 = vld [vmem:[%s5614_s7 + $0xb8] sm:$0xff] }
  0x7d   : > { %470 = vst [vmem:[#allocation2 + $0xc9] sm:$0xff] %v5809_v27  ;;  %v5830_v44 = vadd.f32 %v5688_v32, %v327_v28  ;;  %v329_v46 = vmul.f32 %v5683_v31, %v290_v33  ;;  %4792 = vmatprep.subr.bf16.mxu0 %v4791_v7  ;;  %v395_v50 = vmax.f32 %v5817_v38, 0.0  ;;  %v330_v56 = vmul.f32 %v5683_v31, %v291_v41  ;;  %v293_v58 = vld [vmem:[%s5614_s7 + $0xc0] sm:$0xff]  ;;  %v294_v5 = vld [vmem:[%s5614_s7 + $0xc8] sm:$0xff]  ;;  %v295_v14 = vld [vmem:[%s5614_s7 + $0xd0] sm:$0xff] }
  0x7e   : > { %v396_v52 = vmax.f32 %v5820_v39, 0.0  ;;  %v397_v53 = vmax.f32 %v5823_v40, 0.0  ;;  %3944 = vmatmul.mubr.f32.vlgmr.msra.gmra.mrb[0].mxu1 %v536_v34  ;;  %v5842_v61 = vadd.f32 %v5688_v32, %v328_v45  ;;  %v331_v1 = vmul.f32 %v5683_v31, %v292_v49  ;;  %4264 = vmatmul.mubr.f32.vlgmr.msra.gmra.mrb[0].mxu0 %v5718_v60  ;;  %v523_v10 = vld [vmem:[#allocation6 + $0x20] sm:$0xff]  ;;  %v524_v11 = vld [vmem:[#allocation6 + $0x28] sm:$0xff]  ;;  %v296_v21 = vld [vmem:[%s5614_s7 + $0xd8] sm:$0xff] }
  0x7f   : > { %v398_v59 = vmax.f32 %v5830_v44, 0.0  ;;  %v5845_v63 = vadd.f32 %v5688_v32, %v329_v46  ;;  %4666 = vmatpush3.bf16.msra.mxu1 %v4663_v62  ;;  %v5850_v6 = vpack.c.bf16 %v1985_v43, %v1984_v42  ;;  %471 = vst [vmem:[#allocation2 + $0xd9] sm:$0xff] %v395_v50  ;;  %v5859_v12 = vadd.f32 %v5688_v32, %v330_v56  ;;  %v297_v33 = vld [vmem:[%s5614_s7 + $0xe0] sm:$0xff]  ;;  %v1986_v34 = vld [vmem:[#allocation6 + $0x2b0] sm:$0xff]  ;;  %v1987_v41 = vld [vmem:[#allocation6 + $0x2b8] sm:$0xff] }
  0x80   : > { %472 = vst [vmem:[#allocation2 + $0xe1] sm:$0xff] %v396_v52  ;;  %473 = vst [vmem:[#allocation2 + $0xf1] sm:$0xff] %v397_v53  ;;  %4794 = vmatpush3.bf16.msra.mxu0 %v4791_v7  ;;  %3946 = vmatprep.mubr.f32.mxu1 %v5703_v48  ;;  %v399_v62 = vmax.f32 %v5842_v61, 0.0  ;;  %v5868_v17 = vadd.f32 %v5688_v32, %v331_v1  ;;  %v332_v20 = vmul.f32 %v5683_v31, %v293_v58  ;;  %v298_v46 = vld [vmem:[%s5614_s7 + $0xe8] sm:$0xff]  ;;  %v526_v49 = vld [vmem:[#allocation6 + $0x38] sm:$0xff] }
  0x81   : > { %474 = vst [vmem:[#allocation2 + $0xf9] sm:$0xff] %v398_v59  ;;  %v400_v15 = vmax.f32 %v5845_v63, 0.0  ;;  %4266 = vmatprep.mubr.f32.mxu0 %v5723_v3  ;;  %4796 = vmatprep.subr.bf16.mxu0 %v5805_v24  ;;  %v401_v48 = vmax.f32 %v5859_v12, 0.0  ;;  %v333_v7 = vmul.f32 %v5683_v31, %v294_v5  ;;  %v334_v23 = vmul.f32 %v5683_v31, %v295_v14  ;;  %v6000_v38 = vld [vmem:[#allocation2 + $0x52] sm:$0xff]  ;;  %v6010_v40 = vld [vmem:[#allocation2 + $0x6a] sm:$0xff]  ;;  %v2296_v44 = vld [vmem:[#allocation6 + $0x350] sm:$0xff] }
  0x82   : > { %v335_v28 = vmul.f32 %v5683_v31, %v296_v21  ;;  %3947 = vmatmul.mubr.f32.gmra.mrb[2].mxu1 %v5718_v60  ;;  %4668 = vmatprep.subr.bf16.mxu1 %v5813_v35  ;;  %v4671_v42 = vpack.c.bf16 %v524_v11, %v523_v10  ;;  %475 = vst [vmem:[#allocation2 + $0x109] sm:$0xff] %v399_v62  ;;  %v402_v43 = vmax.f32 %v5868_v17, 0.0  ;;  %v525_v60 = vld [vmem:[#allocation6 + $0x30] sm:$0xff]  ;;  %v1988_v21 = vld [vmem:[#allocation6 + $0x2c0] sm:$0xff] }
  0x83   : > { %476 = vst [vmem:[#allocation2 + $0x111] sm:$0xff] %v400_v15  ;;  %v5887_v45 = vadd.f32 %v5688_v32, %v332_v20  ;;  %4267 = vmatmul.mubr.f32.gmra.mrb[2].mxu0 %v5725_v4  ;;  %3949 = vmatprep.mubr.f32.mxu1 %v5723_v3  ;;  %477 = vst [vmem:[#allocation2 + $0x121] sm:$0xff] %v401_v48  ;;  %v5895_v56 = vadd.f32 %v5688_v32, %v333_v7  ;;  %v1989_v7 = vld [vmem:[#allocation6 + $0x2c8] sm:$0xff]  ;;  %v2294_v39 = vld [vmem:[#allocation6 + $0x340] sm:$0xff] }
  0x84   : > { %v5898_v58 = vadd.f32 %v5688_v32, %v334_v23  ;;  %v5901_v1 = vadd.f32 %v5688_v32, %v335_v28  ;;  %4798 = vmatpush3.bf16.msra.mxu0 %v5805_v24  ;;  %4269 = vmatprep.mubr.f32.mxu0 %v5731_v9  ;;  %478 = vst [vmem:[#allocation2 + $0x129] sm:$0xff] %v402_v43  ;;  %v6020_v61 = vld [vmem:[#allocation2 + $0x82] sm:$0xff]  ;;  %v2298_v63 = vld [vmem:[#allocation6 + $0x360] sm:$0xff]  ;;  %v6030_v12 = vld [vmem:[#allocation2 + $0x9a] sm:$0xff] }
  0x85   : > { %v403_v3 = vmax.f32 %v5887_v45, 0.0  ;;  %v336_v5 = vmul.f32 %v5683_v31, %v297_v33  ;;  %v337_v10 = vmul.f32 %v5683_v31, %v298_v46  ;;  %4800 = vmatprep.subr.bf16.mxu0 %v5850_v6  ;;  %4670 = vmatpush3.bf16.msra.mxu1 %v5813_v35  ;;  %v4803_v11 = vpack.c.bf16 %v1987_v41, %v1986_v34  ;;  %v527_v33 = vld [vmem:[#allocation6 + $0x40] sm:$0xff]  ;;  %v528_v34 = vld [vmem:[#allocation6 + $0x48] sm:$0xff]  ;;  %v1990_v46 = vld [vmem:[#allocation6 + $0x2d0] sm:$0xff] }
  0x86   : > { %v404_v14 = vmax.f32 %v5895_v56, 0.0  ;;  %v405_v24 = vmax.f32 %v5898_v58, 0.0  ;;  %v406_v20 = vmax.f32 %v5901_v1, 0.0  ;;  %3950 = vmatmul.mubr.f32.gmra.mrb[4].mxu1 %v5725_v4  ;;  %4672 = vmatprep.subr.bf16.mxu1 %v4671_v42  ;;  %v4675_v23 = vpack.c.bf16 %v526_v49, %v525_v60  ;;  %v1991_v60 = vld [vmem:[#allocation6 + $0x2d8] sm:$0xff]  ;;  %v2300_v17 = vld [vmem:[#allocation6 + $0x370] sm:$0xff]  ;;  %v6040_v45 = vld [vmem:[#allocation2 + $0xb2] sm:$0xff] }
  0x87   : > { %479 = vst [vmem:[#allocation2 + $0x139] sm:$0xff] %v403_v3  ;;  %v5919_v28 = vadd.f32 %v5688_v32, %v336_v5  ;;  %v5922_v35 = vadd.f32 %v5688_v32, %v337_v10  ;;  %4270 = vmatmul.mubr.f32.gmra.mrb[4].mxu0 %v5746_v22  ;;  %3952 = vmatprep.mubr.f32.mxu1 %v5731_v9  ;;  %v530_v5 = vld [vmem:[#allocation6 + $0x58] sm:$0xff]  ;;  %v1993_v10 = vld [vmem:[#allocation6 + $0x2e8] sm:$0xff]  ;;  %v2591_v56 = vld [vmem:[#allocation6 + $0x380] sm:$0xff] }
  0x88   : > { %480 = vst [vmem:[#allocation2 + $0x141] sm:$0xff] %v404_v14  ;;  %481 = vst [vmem:[#allocation2 + $0x151] sm:$0xff] %v405_v24  ;;  %4802 = vmatpush3.bf16.msra.mxu0 %v5850_v6  ;;  %4272 = vmatprep.mubr.f32.mxu0 %v5751_v29  ;;  %v4807_v9 = vpack.c.bf16 %v1989_v7, %v1988_v21  ;;  %v4679_v49 = vpack.c.bf16 %v528_v34, %v527_v33  ;;  %v529_v6 = vld [vmem:[#allocation6 + $0x50] sm:$0xff]  ;;  %v532_v7 = vld [vmem:[#allocation6 + $0x68] sm:$0xff] }
  0x89   : > { %482 = vst [vmem:[#allocation2 + $0x159] sm:$0xff] %v406_v20  ;;  %v407_v4 = vmax.f32 %v5919_v28, 0.0  ;;  %v408_v41 = vmax.f32 %v5922_v35, 0.0  ;;  %4804 = vmatprep.subr.bf16.mxu0 %v4803_v11  ;;  %4674 = vmatpush3.bf16.msra.mxu1 %v4671_v42  ;;  %v1992_v42 = vld [vmem:[#allocation6 + $0x2e0] sm:$0xff]  ;;  %v4683_v21 = vpack.c.bf16 %v530_v5, %v529_v6  ;;  %v299_v34 = vld [vmem:[%s5614_s7 + $0xf0] sm:$0xff]  ;;  %v6152_v19 = vld [vmem:[#allocation2 + $0xd8] sm:$0xff] }
  0x8a   : > { %3953 = vmatmul.mubr.f32.gmra.mrb[6].mxu1 %v5746_v22  ;;  %4676 = vmatprep.subr.bf16.mxu1 %v4675_v23  ;;  %v4811_v22 = vpack.c.bf16 %v1991_v60, %v1990_v46  ;;  %v300_v46 = vld [vmem:[%s5614_s7 + $0xf8] sm:$0xff]  ;;  %v1067_v1 = vld [vmem:[#allocation6 + $0x110] sm:$0xff]  ;;  %v1069_v35 = vld [vmem:[#allocation6 + $0x120] sm:$0xff]  ;;  %6556 = vst [vmem:[#allocation32_spill] sm:$0xff] %v6152_v19  ;;  %s5326_s7 = scalar_lea.vmem %s5325_s12, 8192 }
  0x8b   : > { %483 = vst [vmem:[#allocation2 + $0x169] sm:$0xff] %v407_v4  ;;  %484 = vst [vmem:[#allocation2 + $0x171] sm:$0xff] %v408_v41  ;;  %4273 = vmatmul.mubr.f32.gmra.mrb[6].mxu0 %v5753_v30  ;;  %3955 = vmatprep.mubr.f32.mxu1 %v5751_v29  ;;  %v531_v29 = vld [vmem:[#allocation6 + $0x60] sm:$0xff]  ;;  %v534_v60 = vld [vmem:[#allocation6 + $0x78] sm:$0xff]  ;;  %v339_v6 = vmul.f32 %v5683_v31, %v300_v46  ;;  %p5328_p13 = scmp.lt.s32.totalorder %s5326_s7, %s5320_s10 }
  0x8c   : > { %4806 = vmatpush3.bf16.msra.mxu0 %v4803_v11  ;;  %4275 = vmatprep.mubr.f32.mxu0 %v5759_v36  ;;  %v4815_v11 = vpack.c.bf16 %v1993_v10, %v1992_v42  ;;  %v4687_v33 = vpack.c.bf16 %v532_v7, %v531_v29  ;;  %v2287_v42 = vld [vmem:[#allocation6 + $0x308] sm:$0xff]  ;;  %v2289_v7 = vld [vmem:[#allocation6 + $0x318] sm:$0xff]  ;;  %v6143_v47 = vld [vmem:[#allocation2 + $0xc0] sm:$0xff] }
  0x8d   : > { %4808 = vmatprep.subr.bf16.mxu0 %v4807_v9  ;;  %4678 = vmatpush3.bf16.msra.mxu1 %v4675_v23  ;;  %v1994_v23 = vld [vmem:[#allocation6 + $0x2f0] sm:$0xff]  ;;  %v5960_v5 = vadd.f32 %v5688_v32, %v339_v6  ;;  %v5992_v46 = vld [vmem:[#allocation2 + $0x4a] sm:$0xff]  ;;  %6554 = vst [vmem:[#allocation30_spill] sm:$0xff] %v6143_v47  ;;  %p5329_p3 = por %p5328_p13, %p5327_p10 }
  0x8e   : > { %3956 = vmatmul.mubr.f32.gmra.mrb[8].mxu1 %v5753_v30  ;;  %4680 = vmatprep.subr.bf16.mxu1 %v4679_v49  ;;  %v1995_v30 = vld [vmem:[#allocation6 + $0x2f8] sm:$0xff]  ;;  %v6175_v37 = vld [vmem:[#allocation2 + $0x110] sm:$0xff]  ;;  %v6178_v26 = vld [vmem:[#allocation2 + $0x120] sm:$0xff] }
  0x8f   : > { %4276 = vmatmul.mubr.f32.gmra.mrb[8].mxu0 %v5774_v51  ;;  %3958 = vmatprep.mubr.f32.mxu1 %v5759_v36  ;;  %v533_v36 = vld [vmem:[#allocation6 + $0x70] sm:$0xff]  ;;  %6545 = vst [vmem:[#allocation21_spill] sm:$0xff] %v5960_v5  ;;  %v6503_v29 = vmax.f32 %v5960_v5, 0.0  ;;  %v6050_v58 = vld [vmem:[#allocation2 + $0xca] sm:$0xff]  ;;  %p5330_p7 = pnand %p5329_p3, %p5323_p8 }
  0x90   : > { %4810 = vmatpush3.bf16.msra.mxu0 %v4807_v9  ;;  %4278 = vmatprep.mubr.f32.mxu0 %v5778_v54  ;;  %v338_v9 = vmul.f32 %v5683_v31, %v299_v34  ;;  %v4691_v10 = vpack.c.bf16 %v534_v60, %v533_v36  ;;  %v1065_v31 = vld [vmem:[#allocation6 + $0x100] sm:$0xff]  ;;  %v2291_v34 = vld [vmem:[#allocation6 + $0x328] sm:$0xff]  ;;  %v2293_v60 = vld [vmem:[#allocation6 + $0x338] sm:$0xff] }
  0x91   : > { %4812 = vmatprep.subr.bf16.mxu0 %v4811_v22  ;;  %4682 = vmatpush3.bf16.msra.mxu1 %v4679_v49  ;;  %486 = vst [vmem:[#allocation2 + $0x189] sm:$0xff] %v6503_v29  ;;  %v6060_v28 = vld [vmem:[#allocation2 + $0xe2] sm:$0xff]  ;;  %v6141_v29 = vld [vmem:[#allocation2 + $0xb0] sm:$0xff] }
  0x92   : > { %3959 = vmatmul.mubr.f32.gmra.mrb[10].mxu1 %v5774_v51  ;;  %4684 = vmatprep.subr.bf16.mxu1 %v4683_v21  ;;  %v4819_v51 = vpack.c.bf16 %v1995_v30, %v1994_v23  ;;  %v5957_v49 = vadd.f32 %v5688_v32, %v338_v9  ;;  %v5968_v32 = vld [vmem:[#allocation2 + $0x1a] sm:$0xff]  ;;  %v5982_v30 = vld [vmem:[#allocation2 + $0x32] sm:$0xff]  ;;  %6553 = vst [vmem:[#allocation29_spill] sm:$0xff] %v6141_v29  ;;  %v6149_v5 = vld [vmem:[#allocation2 + $0xc8] sm:$0xff] }
  0x93   : > { %4279 = vmatmul.mubr.f32.gmra.mrb[10].mxu0 %v5780_v55  ;;  %3961 = vmatprep.mubr.f32.mxu1 %v5778_v54  ;;  %v2286_v54 = vld [vmem:[#allocation6 + $0x300] sm:$0xff]  ;;  %6555 = vst [vmem:[#allocation31_spill] sm:$0xff] %v6149_v5 }
  0x94   : > { %4814 = vmatpush3.bf16.msra.mxu0 %v4811_v22  ;;  %4281 = vmatprep.mubr.f32.mxu0 %v5787_v2  ;;  %6544 = vst [vmem:[#allocation20_spill] sm:$0xff] %v5957_v49  ;;  %v1066_v22 = vld [vmem:[#allocation6 + $0x108] sm:$0xff] }
  0x95   : > { %4816 = vmatprep.subr.bf16.mxu0 %v4815_v11  ;;  %4686 = vmatpush3.bf16.msra.mxu1 %v4683_v21  ;;  %v6504_v21 = vmax.f32 %v5957_v49, 0.0  ;;  %v5975_v23 = vpack.c.bf16 %v1066_v22, %v1065_v31  ;;  %v6064_v22 = vld [vmem:[#allocation2 + $0xf2] sm:$0xff] }
  0x96   : > { %3962 = vmatmul.mubr.f32.gmra.mrb[12].mxu1 %v5780_v55  ;;  %4688 = vmatprep.subr.bf16.mxu1 %v4687_v33  ;;  %v4823_v55 = vpack.c.bf16 %v2287_v42, %v2286_v54  ;;  %v6167_v49 = vld [vmem:[#allocation2 + $0xf8] sm:$0xff] }
  0x97   : > { %4282 = vmatmul.mubr.f32.gmra.mrb[12].mxu0 %v5799_v16  ;;  %3964 = vmatprep.mubr.f32.mxu1 %v5787_v2  ;;  %485 = vst [vmem:[#allocation2 + $0x181] sm:$0xff] %v6504_v21  ;;  %v2288_v2 = vld [vmem:[#allocation6 + $0x310] sm:$0xff] }
  0x98   : > { %4818 = vmatpush3.bf16.msra.mxu0 %v4815_v11  ;;  %4284 = vmatprep.mubr.f32.mxu0 %v5807_v25  ;;  %v5980_v11 = vld [vmem:[#allocation2 + $0x22] sm:$0xff]  ;;  %v1979_v21 = vld [vmem:[#allocation2 + $0x18a] sm:$0xff] }
  0x99   : > { %4820 = vmatprep.subr.bf16.mxu0 %v4819_v51  ;;  %4690 = vmatpush3.bf16.msra.mxu1 %v4687_v33  ;;  %v4827_v33 = vpack.c.bf16 %v2289_v7, %v2288_v2  ;;  %v6070_v2 = vld [vmem:[#allocation2 + $0x20] sm:$0xff] }
  0x9a   : > { %3965 = vmatmul.mubr.f32.gmra.mrb[14].mxu1 %v5799_v16  ;;  %4692 = vmatprep.subr.bf16.mxu1 %v4691_v10  ;;  %v2290_v16 = vld [vmem:[#allocation6 + $0x320] sm:$0xff]  ;;  %v6074_v7 = vld [vmem:[#allocation2 + $0xfa] sm:$0xff] }
  0x9b   : > { %4285 = vmatmul.mubr.f32.gmra.mrb[14].mxu0 %v5809_v27  ;;  %3967 = vmatprep.mubr.f32.mxu1 %v5807_v25  ;;  %v5990_v25 = vld [vmem:[#allocation2 + $0x3a] sm:$0xff]  ;;  %v4831_v36 = vpack.c.bf16 %v2291_v34, %v2290_v16  ;;  %v6078_v16 = vld [vmem:[#allocation2 + $0x10a] sm:$0xff] }
  0x9c   : > { %4822 = vmatpush3.bf16.msra.mxu0 %v4819_v51  ;;  %4343 = vmatprep.mubr.f32.mxu0 %v5968_v32  ;;  %v1071_v34 = vld [vmem:[#allocation6 + $0x130] sm:$0xff] }
  0x9d   : > { %4824 = vmatprep.subr.bf16.mxu0 %v4823_v55  ;;  %4694 = vmatpush3.bf16.msra.mxu1 %v4691_v10  ;;  %v6052_v10 = vld [vmem:[#allocation2 + $0xda] sm:$0xff] }
  0x9e   : > { %3968 = vmatmul.mubr.f32.gmra.mrb[16].mxu1 %v5809_v27  ;;  %4696 = vmatprep.subr.bf16.mxu1 %v5975_v23  ;;  %v2292_v27 = vld [vmem:[#allocation6 + $0x330] sm:$0xff] }
  0x9f   : > { %4344 = vmatmul.mubr.f32.vlgmr.msra.gmra.mrb[0].mxu0 %v5980_v11  ;;  %3970 = vmatprep.mubr.f32.mxu1 %v395_v50  ;;  %v6002_v50 = vld [vmem:[#allocation2 + $0x62] sm:$0xff]  ;;  %v4835_v9 = vpack.c.bf16 %v2293_v60, %v2292_v27  ;;  %v6086_v27 = vld [vmem:[#allocation2 + $0x112] sm:$0xff] }
  0xa0   : > { %4826 = vmatpush3.bf16.msra.mxu0 %v4823_v55  ;;  %4346 = vmatprep.mubr.f32.mxu0 %v5982_v30  ;;  %v6088_v60 = vld [vmem:[#allocation2 + $0x48] sm:$0xff] }
  0xa1   : > { %4828 = vmatprep.subr.bf16.mxu0 %v4827_v33 }
  0xa2   : > { %3971 = vmatmul.mubr.f32.gmra.mrb[18].mxu1 %v396_v52  ;;  %v2295_v52 = vld [vmem:[#allocation6 + $0x348] sm:$0xff] }
  0xa3   : > { %4347 = vmatmul.mubr.f32.gmra.mrb[2].mxu0 %v5990_v25  ;;  %3973 = vmatprep.mubr.f32.mxu1 %v397_v53  ;;  %v6012_v53 = vld [vmem:[#allocation2 + $0x7a] sm:$0xff]  ;;  %v4839_v6 = vpack.c.bf16 %v2295_v52, %v2294_v39  ;;  %v1073_v52 = vld [vmem:[#allocation6 + $0x140] sm:$0xff] }
  0xa4   : > { %4349 = vmatprep.mubr.f32.mxu0 %v5992_v46  ;;  %4830 = vmatpush3.bf16.msra.mxu0 %v4827_v33  ;;  %v6076_v33 = vld [vmem:[#allocation2 + $0x30] sm:$0xff] }
  0xa5   : > { %4832 = vmatprep.subr.bf16.mxu0 %v4831_v36 }
  0xa6   : > { %3974 = vmatmul.mubr.f32.gmra.mrb[20].mxu1 %v398_v59  ;;  %v2297_v59 = vld [vmem:[#allocation6 + $0x358] sm:$0xff] }
  0xa7   : > { %4350 = vmatmul.mubr.f32.gmra.mrb[4].mxu0 %v6000_v38  ;;  %3976 = vmatprep.mubr.f32.mxu1 %v399_v62  ;;  %v6022_v62 = vld [vmem:[#allocation2 + $0x92] sm:$0xff]  ;;  %v4843_v51 = vpack.c.bf16 %v2297_v59, %v2296_v44  ;;  %v6098_v59 = vld [vmem:[#allocation2 + $0x12a] sm:$0xff] }
  0xa8   : > { %4352 = vmatprep.mubr.f32.mxu0 %v6002_v50  ;;  %4834 = vmatpush3.bf16.msra.mxu0 %v4831_v36  ;;  %v1072_v36 = vld [vmem:[#allocation6 + $0x138] sm:$0xff]  ;;  %v6095_v44 = vld [vmem:[#allocation2 + $0x50] sm:$0xff] }
  0xa9   : > { %4836 = vmatprep.subr.bf16.mxu0 %v4835_v9  ;;  %v4707_v39 = vpack.c.bf16 %v1072_v36, %v1071_v34  ;;  %v1079_v36 = vld [vmem:[#allocation6 + $0x170] sm:$0xff] }
  0xaa   : > { %3977 = vmatmul.mubr.f32.gmra.mrb[22].mxu1 %v400_v15  ;;  %v2299_v15 = vld [vmem:[#allocation6 + $0x368] sm:$0xff] }
  0xab   : > { %4353 = vmatmul.mubr.f32.gmra.mrb[6].mxu0 %v6010_v40  ;;  %3979 = vmatprep.mubr.f32.mxu1 %v401_v48  ;;  %v6032_v48 = vld [vmem:[#allocation2 + $0xaa] sm:$0xff]  ;;  %v4847_v54 = vpack.c.bf16 %v2299_v15, %v2298_v63  ;;  %v6102_v63 = vld [vmem:[#allocation2 + $0x13a] sm:$0xff] }
  0xac   : > { %4355 = vmatprep.mubr.f32.mxu0 %v6012_v53  ;;  %4838 = vmatpush3.bf16.msra.mxu0 %v4835_v9  ;;  %v6090_v9 = vld [vmem:[#allocation2 + $0x122] sm:$0xff] }
  0xad   : > { %4840 = vmatprep.subr.bf16.mxu0 %v4839_v6 }
  0xae   : > { %3980 = vmatmul.mubr.f32.gmra.mrb[24].mxu1 %v402_v43  ;;  %v2301_v43 = vld [vmem:[#allocation6 + $0x378] sm:$0xff] }
  0xaf   : > { %4356 = vmatmul.mubr.f32.gmra.mrb[8].mxu0 %v6020_v61  ;;  %3982 = vmatprep.mubr.f32.mxu1 %v403_v3  ;;  %v6042_v3 = vld [vmem:[#allocation2 + $0xc2] sm:$0xff]  ;;  %v4851_v42 = vpack.c.bf16 %v2301_v43, %v2300_v17 }
  0xb0   : > { %4358 = vmatprep.mubr.f32.mxu0 %v6022_v62  ;;  %4842 = vmatpush3.bf16.msra.mxu0 %v4839_v6  ;;  %v1074_v6 = vld [vmem:[#allocation6 + $0x148] sm:$0xff]  ;;  %v1076_v17 = vld [vmem:[#allocation6 + $0x158] sm:$0xff] }
  0xb1   : > { %4844 = vmatprep.subr.bf16.mxu0 %v4843_v51  ;;  %v4711_v15 = vpack.c.bf16 %v1074_v6, %v1073_v52  ;;  %v6107_v43 = vld [vmem:[#allocation2 + $0x68] sm:$0xff]  ;;  %v6131_v52 = vld [vmem:[#allocation2 + $0x98] sm:$0xff] }
  0xb2   : > { %3983 = vmatmul.mubr.f32.gmra.mrb[26].mxu1 %v404_v14  ;;  %v2592_v14 = vld [vmem:[#allocation6 + $0x388] sm:$0xff]  ;;  %6547 = vst [vmem:[#allocation23_spill] sm:$0xff] %v6107_v43  ;;  %6551 = vst [vmem:[#allocation27_spill] sm:$0xff] %v6131_v52 }
  0xb3   : > { %4359 = vmatmul.mubr.f32.gmra.mrb[10].mxu0 %v6030_v12  ;;  %3985 = vmatprep.mubr.f32.mxu1 %v405_v24  ;;  %v487_v24 = vld [vmem:[#allocation2] sm:$0xff]  ;;  %v6054_v31 = vpack.c.bf16 %v2592_v14, %v2591_v56  ;;  %v6112_v56 = vld [vmem:[#allocation2 + $0x78] sm:$0xff] }
  0xb4   : > { %4361 = vmatprep.mubr.f32.mxu0 %v6032_v48  ;;  %4846 = vmatpush3.bf16.msra.mxu0 %v4843_v51  ;;  %v6100_v51 = vld [vmem:[#allocation2 + $0x60] sm:$0xff]  ;;  %6548 = vst [vmem:[#allocation24_spill] sm:$0xff] %v6112_v56  ;;  %v6114_v14 = vld [vmem:[#allocation2 + $0x152] sm:$0xff] }
  0xb5   : > { %4848 = vmatprep.subr.bf16.mxu0 %v4847_v54  ;;  %6546 = vst [vmem:[#allocation22_spill] sm:$0xff] %v6100_v51  ;;  %v6134_v6 = vld [vmem:[#allocation2 + $0x172] sm:$0xff] }
  0xb6   : > { %3986 = vmatmul.mubr.f32.gmra.mrb[28].mxu1 %v406_v20  ;;  %v1068_v20 = vld [vmem:[#allocation6 + $0x118] sm:$0xff] }
  0xb7   : > { %4362 = vmatmul.mubr.f32.gmra.mrb[12].mxu0 %v6040_v45  ;;  %3988 = vmatprep.mubr.f32.mxu1 %v407_v4  ;;  %v6062_v4 = vld [vmem:[#allocation2 + $0x18] sm:$0xff]  ;;  %v4699_v55 = vpack.c.bf16 %v1068_v20, %v1067_v1  ;;  %v1077_v1 = vld [vmem:[#allocation6 + $0x160] sm:$0xff] }
  0xb8   : > { %4364 = vmatprep.mubr.f32.mxu0 %v6042_v3  ;;  %4850 = vmatpush3.bf16.msra.mxu0 %v4847_v54  ;;  %v1075_v54 = vld [vmem:[#allocation6 + $0x150] sm:$0xff]  ;;  %v1078_v20 = vld [vmem:[#allocation6 + $0x168] sm:$0xff] }
  0xb9   : > { %4852 = vmatprep.subr.bf16.mxu0 %v4851_v42  ;;  %v4719_v34 = vpack.c.bf16 %v1078_v20, %v1077_v1  ;;  %v1370_v1 = vld [vmem:[#allocation6 + $0x180] sm:$0xff]  ;;  %v1371_v20 = vld [vmem:[#allocation6 + $0x188] sm:$0xff] }
  0xba   : > { %3989 = vmatmul.mubr.f32.gmra.mrb[30].mxu1 %v408_v41  ;;  %v1070_v41 = vld [vmem:[#allocation6 + $0x128] sm:$0xff] }
  0xbb   : > { %4365 = vmatmul.mubr.f32.gmra.mrb[14].mxu0 %v6050_v58  ;;  %4023 = vmatprep.mubr.f32.mxu1 %v487_v24  ;;  %v4715_v24 = vpack.c.bf16 %v1076_v17, %v1075_v54  ;;  %v6136_v54 = vld [vmem:[#allocation2 + $0xa8] sm:$0xff] }
  0xbc   : > { %4367 = vmatprep.mubr.f32.mxu0 %v6052_v10  ;;  %4854 = vmatpush3.bf16.msra.mxu0 %v4851_v42  ;;  %v6110_v42 = vld [vmem:[#allocation2 + $0x142] sm:$0xff]  ;;  %6552 = vst [vmem:[#allocation28_spill] sm:$0xff] %v6136_v54 }
  0xbd   : > { %4856 = vmatprep.subr.bf16.mxu0 %v6054_v31 }
  0xbe   : > { %4024 = vmatmul.mubr.f32.vlgmr.msra.gmra.mrb[0].mxu1 %v5428_v0  ;;  %v4703_v0 = vpack.c.bf16 %v1070_v41, %v1069_v35  ;;  %v6122_v35 = vld [vmem:[#allocation2 + $0x15a] sm:$0xff]  ;;  %v6124_v41 = vld [vmem:[#allocation2 + $0x90] sm:$0xff] }
  0xbf   : > { %4368 = vmatmul.mubr.f32.gmra.mrb[16].mxu0 %v6060_v28  ;;  %4698 = vmatpush3.bf16.msra.mxu1 %v5975_v23  ;;  %v6083_v23 = vld [vmem:[#allocation2 + $0x38] sm:$0xff]  ;;  %6550 = vst [vmem:[#allocation26_spill] sm:$0xff] %v6124_v41 }
  0xc0   : > { %4026 = vmatprep.mubr.f32.mxu1 %v6062_v4  ;;  %4370 = vmatprep.mubr.f32.mxu0 %v6064_v22 }
  0xc1   : > { %4700 = vmatprep.subr.bf16.mxu1 %v4699_v55 }
  0xc2   : > { %4027 = vmatmul.mubr.f32.gmra.mrb[2].mxu1 %v6070_v2 }
  0xc3   : > { %4371 = vmatmul.mubr.f32.gmra.mrb[18].mxu0 %v6074_v7  ;;  %4029 = vmatprep.mubr.f32.mxu1 %v6076_v33 }
  0xc4   : > { %4373 = vmatprep.mubr.f32.mxu0 %v6078_v16  ;;  %4702 = vmatpush3.bf16.msra.mxu1 %v4699_v55  ;;  %v6119_v55 = vld [vmem:[#allocation2 + $0x80] sm:$0xff] }
  0xc5   : > { %4704 = vmatprep.subr.bf16.mxu1 %v4703_v0  ;;  %6549 = vst [vmem:[#allocation25_spill] sm:$0xff] %v6119_v55 }
  0xc6   : > { %4030 = vmatmul.mubr.f32.gmra.mrb[4].mxu1 %v6083_v23 }
  0xc7   : > { %4374 = vmatmul.mubr.f32.gmra.mrb[20].mxu0 %v6086_v27  ;;  %4032 = vmatprep.mubr.f32.mxu1 %v6088_v60 }
  0xc8   : > { %4376 = vmatprep.mubr.f32.mxu0 %v6090_v9  ;;  %4706 = vmatpush3.bf16.msra.mxu1 %v4703_v0  ;;  %v6126_v0 = vld [vmem:[#allocation2 + $0x16a] sm:$0xff] }
  0xc9   : > { %4708 = vmatprep.subr.bf16.mxu1 %v4707_v39 }
  0xca   : > { %4033 = vmatmul.mubr.f32.gmra.mrb[6].mxu1 %v6095_v44 }
  0xcb   : > { %4377 = vmatmul.mubr.f32.gmra.mrb[22].mxu0 %v6098_v59  ;;  %4035 = vmatprep.mubr.f32.mxu1 %v6100_v51 }
  0xcc   : > { %4379 = vmatprep.mubr.f32.mxu0 %v6102_v63  ;;  %4710 = vmatpush3.bf16.msra.mxu1 %v4707_v39  ;;  %v1080_v39 = vld [vmem:[#allocation6 + $0x178] sm:$0xff] }
  0xcd   : > { %4712 = vmatprep.subr.bf16.mxu1 %v4711_v15  ;;  %v4723_v17 = vpack.c.bf16 %v1080_v39, %v1079_v36  ;;  %v2593_v36 = vld [vmem:[#allocation6 + $0x390] sm:$0xff]  ;;  %v2594_v39 = vld [vmem:[#allocation6 + $0x398] sm:$0xff] }
  0xce   : > { %4036 = vmatmul.mubr.f32.gmra.mrb[8].mxu1 %v6107_v43 }
  0xcf   : > { %4380 = vmatmul.mubr.f32.gmra.mrb[24].mxu0 %v6110_v42  ;;  %4038 = vmatprep.mubr.f32.mxu1 %v6112_v56 }
  0xd0   : > { %4382 = vmatprep.mubr.f32.mxu0 %v6114_v14  ;;  %4714 = vmatpush3.bf16.msra.mxu1 %v4711_v15  ;;  %v1978_v15 = vld [vmem:[#allocation2 + $0x182] sm:$0xff] }
  0xd1   : > { %4716 = vmatprep.subr.bf16.mxu1 %v4715_v24 }
  0xd2   : > { %4039 = vmatmul.mubr.f32.gmra.mrb[10].mxu1 %v6119_v55 }
  0xd3   : > { %4383 = vmatmul.mubr.f32.gmra.mrb[26].mxu0 %v6122_v35  ;;  %4041 = vmatprep.mubr.f32.mxu1 %v6124_v41 }
  0xd4   : > { %4385 = vmatprep.mubr.f32.mxu0 %v6126_v0  ;;  %4718 = vmatpush3.bf16.msra.mxu1 %v4715_v24  ;;  %v6145_v24 = vpack.c.bf16 %v1371_v20, %v1370_v1  ;;  %v2596_v1 = vld [vmem:[#allocation6 + $0x3a8] sm:$0xff]  ;;  %v6162_v20 = vld [vmem:[#allocation2 + $0xf0] sm:$0xff] }
  0xd5   : > { %4720 = vmatprep.subr.bf16.mxu1 %v4719_v34 }
  0xd6   : > { %4042 = vmatmul.mubr.f32.gmra.mrb[12].mxu1 %v6131_v52 }
  0xd7   : > { %4386 = vmatmul.mubr.f32.gmra.mrb[28].mxu0 %v6134_v6  ;;  %4044 = vmatprep.mubr.f32.mxu1 %v6136_v54 }
  0xd8   : > { %4388 = vmatprep.mubr.f32.mxu0 %v1978_v15  ;;  %4722 = vmatpush3.bf16.msra.mxu1 %v4719_v34  ;;  %v4859_v15 = vpack.c.bf16 %v2594_v39, %v2593_v36  ;;  %v2595_v34 = vld [vmem:[#allocation6 + $0x3a0] sm:$0xff]  ;;  %v2597_v36 = vld [vmem:[#allocation6 + $0x3b0] sm:$0xff]  ;;  %v2598_v39 = vld [vmem:[#allocation6 + $0x3b8] sm:$0xff] }
  0xd9   : > { %4724 = vmatprep.subr.bf16.mxu1 %v4723_v17  ;;  %v4867_v57 = vpack.c.bf16 %v2598_v39, %v2597_v36  ;;  %v2601_v36 = vld [vmem:[#allocation6 + $0x3d0] sm:$0xff]  ;;  %v2602_v39 = vld [vmem:[#allocation6 + $0x3d8] sm:$0xff] }
  0xda   : > { %4045 = vmatmul.mubr.f32.gmra.mrb[14].mxu1 %v6141_v29 }
  0xdb   : > { %4389 = vmatmul.mubr.f32.gmra.mrb[30].mxu0 %v1979_v21  ;;  %4047 = vmatprep.mubr.f32.mxu1 %v6143_v47  ;;  %v6158_v21 = vld [vmem:[#allocation2 + $0xe0] sm:$0xff] }
  0xdc   : > { %4423 = vmatprep.mubr.f32.mxu0 %v6076_v33  ;;  %4726 = vmatpush3.bf16.msra.mxu1 %v4723_v17  ;;  %v4863_v17 = vpack.c.bf16 %v2596_v1, %v2595_v34  ;;  %v2599_v34 = vld [vmem:[#allocation6 + $0x3c0] sm:$0xff]  ;;  %v2600_v1 = vld [vmem:[#allocation6 + $0x3c8] sm:$0xff] }
  0xdd   : > { %4728 = vmatprep.subr.bf16.mxu1 %v6145_v24 }
  0xde   : > { %4048 = vmatmul.mubr.f32.gmra.mrb[16].mxu1 %v6149_v5 }
  0xdf   : > { %4424 = vmatmul.mubr.f32.vlgmr.msra.gmra.mrb[0].mxu0 %v6083_v23  ;;  %4050 = vmatprep.mubr.f32.mxu1 %v6152_v19 }
  0xe0   : > { %4858 = vmatpush3.bf16.msra.mxu0 %v6054_v31  ;;  %4426 = vmatprep.mubr.f32.mxu0 %v6088_v60  ;;  %v6170_v31 = vld [vmem:[#allocation2 + $0x108] sm:$0xff] }
  0xe1   : > { %4860 = vmatprep.subr.bf16.mxu0 %v4859_v15 }
  0xe2   : > { %4051 = vmatmul.mubr.f32.gmra.mrb[18].mxu1 %v6158_v21 }
  0xe3   : > { %4427 = vmatmul.mubr.f32.gmra.mrb[2].mxu0 %v6095_v44  ;;  %4053 = vmatprep.mubr.f32.mxu1 %v6162_v20 }
  0xe4   : > { %4429 = vmatprep.mubr.f32.mxu0 %v6100_v51  ;;  %4862 = vmatpush3.bf16.msra.mxu0 %v4859_v15  ;;  %v4871_v15 = vpack.c.bf16 %v2600_v1, %v2599_v34  ;;  %v6186_v51 = vld [vmem:[#allocation2 + $0x138] sm:$0xff]  ;;  %v6191_v1 = vld [vmem:[#allocation2 + $0x140] sm:$0xff] }
  0xe5   : > { %4864 = vmatprep.subr.bf16.mxu0 %v4863_v17  ;;  %v2604_v34 = vld [vmem:[#allocation6 + $0x3e8] sm:$0xff] }
  0xe6   : > { %4054 = vmatmul.mubr.f32.gmra.mrb[20].mxu1 %v6167_v49 }
  0xe7   : > { %4430 = vmatmul.mubr.f32.gmra.mrb[4].mxu0 %v6107_v43  ;;  %4056 = vmatprep.mubr.f32.mxu1 %v6170_v31  ;;  %v6183_v43 = vld [vmem:[#allocation2 + $0x128] sm:$0xff] }
  0xe8   : > { %4432 = vmatprep.mubr.f32.mxu0 %v6112_v56  ;;  %4866 = vmatpush3.bf16.msra.mxu0 %v4863_v17  ;;  %v4875_v56 = vpack.c.bf16 %v2602_v39, %v2601_v36  ;;  %v2603_v17 = vld [vmem:[#allocation6 + $0x3e0] sm:$0xff]  ;;  %v2606_v36 = vld [vmem:[#allocation6 + $0x3f8] sm:$0xff]  ;;  %v6199_v39 = vld [vmem:[#allocation2 + $0x158] sm:$0xff] }
  0xe9   : > { %4868 = vmatprep.subr.bf16.mxu0 %v4867_v57 }
  0xea   : > { %4057 = vmatmul.mubr.f32.gmra.mrb[22].mxu1 %v6175_v37 }
  0xeb   : > { %4433 = vmatmul.mubr.f32.gmra.mrb[6].mxu0 %v6119_v55  ;;  %4059 = vmatprep.mubr.f32.mxu1 %v6178_v26  ;;  %v6194_v55 = vld [vmem:[#allocation2 + $0x150] sm:$0xff] }
  0xec   : > { %4435 = vmatprep.mubr.f32.mxu0 %v6124_v41  ;;  %4870 = vmatpush3.bf16.msra.mxu0 %v4867_v57  ;;  %v4879_v41 = vpack.c.bf16 %v2604_v34, %v2603_v17  ;;  %v2605_v57 = vld [vmem:[#allocation6 + $0x3f0] sm:$0xff]  ;;  %v2897_v17 = vld [vmem:[#allocation6 + $0x408] sm:$0xff]  ;;  %v6207_v34 = vld [vmem:[#allocation2 + $0x170] sm:$0xff] }
  0xed   : > { %4872 = vmatprep.subr.bf16.mxu0 %v4871_v15 }
  0xee   : > { %4060 = vmatmul.mubr.f32.gmra.mrb[24].mxu1 %v6183_v43 }
  0xef   : > { %4436 = vmatmul.mubr.f32.gmra.mrb[8].mxu0 %v6131_v52  ;;  %4062 = vmatprep.mubr.f32.mxu1 %v6186_v51  ;;  %v6202_v52 = vld [vmem:[#allocation2 + $0x168] sm:$0xff] }
  0xf0   : > { %4438 = vmatprep.mubr.f32.mxu0 %v6136_v54  ;;  %4874 = vmatpush3.bf16.msra.mxu0 %v4871_v15  ;;  %v4883_v54 = vpack.c.bf16 %v2606_v36, %v2605_v57  ;;  %v2896_v15 = vld [vmem:[#allocation6 + $0x400] sm:$0xff]  ;;  %v1373_v57 = vld [vmem:[#allocation6 + $0x198] sm:$0xff] }
  0xf1   : > { %4876 = vmatprep.subr.bf16.mxu0 %v4875_v56  ;;  %v1034_v36 = vld [vmem:[#allocation2 + $0xa] sm:$0xff] }
  0xf2   : > { %4063 = vmatmul.mubr.f32.gmra.mrb[26].mxu1 %v6191_v1 }
  0xf3   : > { %4439 = vmatmul.mubr.f32.gmra.mrb[10].mxu0 %v6141_v29  ;;  %4065 = vmatprep.mubr.f32.mxu1 %v6194_v55  ;;  %v1033_v29 = vld [vmem:[#allocation2 + $0x2] sm:$0xff] }
  0xf4   : > { %4441 = vmatprep.mubr.f32.mxu0 %v6143_v47  ;;  %4878 = vmatpush3.bf16.msra.mxu0 %v4875_v56  ;;  %v6210_v47 = vpack.c.bf16 %v2897_v17, %v2896_v15  ;;  %v1372_v56 = vld [vmem:[#allocation6 + $0x190] sm:$0xff] }
  0xf5   : > { %4880 = vmatprep.subr.bf16.mxu0 %v4879_v41  ;;  %v1376_v15 = vld [vmem:[#allocation6 + $0x1b0] sm:$0xff] }
  0xf6   : > { %4066 = vmatmul.mubr.f32.gmra.mrb[28].mxu1 %v6199_v39 }
  0xf7   : > { %4442 = vmatmul.mubr.f32.gmra.mrb[12].mxu0 %v6149_v5  ;;  %4068 = vmatprep.mubr.f32.mxu1 %v6202_v52  ;;  %v4731_v5 = vpack.c.bf16 %v1373_v57, %v1372_v56  ;;  %v1384_v56 = vld [vmem:[#allocation6 + $0x1f0] sm:$0xff]  ;;  %v1385_v57 = vld [vmem:[#allocation6 + $0x1f8] sm:$0xff] }
  0xf8   : > { %4444 = vmatprep.mubr.f32.mxu0 %v6152_v19  ;;  %4882 = vmatpush3.bf16.msra.mxu0 %v4879_v41  ;;  %v1374_v19 = vld [vmem:[#allocation6 + $0x1a0] sm:$0xff]  ;;  %v1375_v41 = vld [vmem:[#allocation6 + $0x1a8] sm:$0xff] }
  0xf9   : > { %4884 = vmatprep.subr.bf16.mxu0 %v4883_v54 }
  0xfa   : > { %4069 = vmatmul.mubr.f32.gmra.mrb[30].mxu1 %v6207_v34 }
  0xfb   : > { %4445 = vmatmul.mubr.f32.gmra.mrb[14].mxu0 %v6158_v21  ;;  %4103 = vmatprep.mubr.f32.mxu1 %v1033_v29  ;;  %v4735_v29 = vpack.c.bf16 %v1375_v41, %v1374_v19  ;;  %v2899_v41 = vld [vmem:[#allocation6 + $0x418] sm:$0xff] }
  0xfc   : > { %4447 = vmatprep.mubr.f32.mxu0 %v6162_v20  ;;  %4886 = vmatpush3.bf16.msra.mxu0 %v4883_v54  ;;  %v1377_v54 = vld [vmem:[#allocation6 + $0x1b8] sm:$0xff] }
  0xfd   : > { %4888 = vmatprep.subr.bf16.mxu0 %v6210_v47  ;;  %v4739_v17 = vpack.c.bf16 %v1377_v54, %v1376_v15  ;;  %v2560_v15 = vld [vmem:[#allocation2 + $0x39] sm:$0xff] }
  0xfe   : > { %4104 = vmatmul.mubr.f32.vlgmr.msra.gmra.mrb[0].mxu1 %v1034_v36  ;;  %v4755_v36 = vpack.c.bf16 %v1385_v57, %v1384_v56  ;;  %v2909_v57 = vld [vmem:[#allocation6 + $0x468] sm:$0xff] }
  0xff   : > { %4448 = vmatmul.mubr.f32.gmra.mrb[16].mxu0 %v6167_v49  ;;  %4730 = vmatpush3.bf16.msra.mxu1 %v6145_v24  ;;  %v1379_v24 = vld [vmem:[#allocation6 + $0x1c8] sm:$0xff] }
 0x100   : > { %4106 = vmatprep.mubr.f32.mxu1 %v5968_v32  ;;  %4450 = vmatprep.mubr.f32.mxu0 %v6170_v31  ;;  %v1378_v32 = vld [vmem:[#allocation6 + $0x1c0] sm:$0xff] }
 0x101   : > { %4732 = vmatprep.subr.bf16.mxu1 %v4731_v5  ;;  %v4743_v19 = vpack.c.bf16 %v1379_v24, %v1378_v32  ;;  %v2563_v32 = vld [vmem:[#allocation2 + $0x61] sm:$0xff] }
 0x102   : > { %4107 = vmatmul.mubr.f32.gmra.mrb[2].mxu1 %v5980_v11  ;;  %v1380_v11 = vld [vmem:[#allocation6 + $0x1d0] sm:$0xff] }
 0x103   : > { %4451 = vmatmul.mubr.f32.gmra.mrb[18].mxu0 %v6175_v37  ;;  %4109 = vmatprep.mubr.f32.mxu1 %v5982_v30  ;;  %v1381_v30 = vld [vmem:[#allocation6 + $0x1d8] sm:$0xff]  ;;  %v2902_v24 = vld [vmem:[#allocation6 + $0x430] sm:$0xff] }
 0x104   : > { %4453 = vmatprep.mubr.f32.mxu0 %v6178_v26  ;;  %4734 = vmatpush3.bf16.msra.mxu1 %v4731_v5  ;;  %v4747_v5 = vpack.c.bf16 %v1381_v30, %v1380_v11  ;;  %v2565_v11 = vld [vmem:[#allocation2 + $0x79] sm:$0xff] }
 0x105   : > { %4736 = vmatprep.subr.bf16.mxu1 %v4735_v29  ;;  %v2905_v30 = vld [vmem:[#allocation6 + $0x448] sm:$0xff] }
 0x106   : > { %4110 = vmatmul.mubr.f32.gmra.mrb[4].mxu1 %v5990_v25  ;;  %v1382_v25 = vld [vmem:[#allocation6 + $0x1e0] sm:$0xff] }
 0x107   : > { %4454 = vmatmul.mubr.f32.gmra.mrb[20].mxu0 %v6183_v43  ;;  %4112 = vmatprep.mubr.f32.mxu1 %v5992_v46  ;;  %v1383_v46 = vld [vmem:[#allocation6 + $0x1e8] sm:$0xff] }
 0x108   : > { %4456 = vmatprep.mubr.f32.mxu0 %v6186_v51  ;;  %4738 = vmatpush3.bf16.msra.mxu1 %v4735_v29  ;;  %v5258_v29 = vld [vmem:[#allocation2 + $0x8] sm:$0xff] }
 0x109   : > { %4740 = vmatprep.subr.bf16.mxu1 %v4739_v17 }
 0x10a   : > { %4113 = vmatmul.mubr.f32.gmra.mrb[6].mxu1 %v6000_v38  ;;  %v6236_v38 = vld [vmem:[#allocation2 + $0x180] sm:$0xff] }
 0x10b   : > { %4457 = vmatmul.mubr.f32.gmra.mrb[22].mxu0 %v6191_v1  ;;  %4115 = vmatprep.mubr.f32.mxu1 %v6002_v50  ;;  %v4751_v50 = vpack.c.bf16 %v1383_v46, %v1382_v25  ;;  %v2907_v46 = vld [vmem:[#allocation6 + $0x458] sm:$0xff] }
 0x10c   : > { %4459 = vmatprep.mubr.f32.mxu0 %v6194_v55  ;;  %4742 = vmatpush3.bf16.msra.mxu1 %v4739_v17  ;;  %v2901_v17 = vld [vmem:[#allocation6 + $0x428] sm:$0xff] }
 0x10d   : > { %4744 = vmatprep.subr.bf16.mxu1 %v4743_v19 }
 0x10e   : > { %4116 = vmatmul.mubr.f32.gmra.mrb[8].mxu1 %v6010_v40  ;;  %v6242_v40 = vld [vmem:[#allocation2 + $0x188] sm:$0xff] }
 0x10f   : > { %4460 = vmatmul.mubr.f32.gmra.mrb[24].mxu0 %v6199_v39  ;;  %4118 = vmatprep.mubr.f32.mxu1 %v6012_v53  ;;  %v2284_v53 = vld [vmem:[#allocation2 + $0x198] sm:$0xff] }
 0x110   : > { %4462 = vmatprep.mubr.f32.mxu0 %v6202_v52  ;;  %4746 = vmatpush3.bf16.msra.mxu1 %v4743_v19  ;;  %v2903_v19 = vld [vmem:[#allocation6 + $0x438] sm:$0xff] }
 0x111   : > { %4748 = vmatprep.subr.bf16.mxu1 %v4747_v5 }
 0x112   : > { %4119 = vmatmul.mubr.f32.gmra.mrb[10].mxu1 %v6020_v61  ;;  %v2559_v61 = vld [vmem:[#allocation2 + $0x31] sm:$0xff] }
 0x113   : > { %4463 = vmatmul.mubr.f32.gmra.mrb[26].mxu0 %v6207_v34  ;;  %4121 = vmatprep.mubr.f32.mxu1 %v6022_v62  ;;  %v2898_v62 = vld [vmem:[#allocation6 + $0x410] sm:$0xff] }
 0x114   : > { %4465 = vmatprep.mubr.f32.mxu0 %v6236_v38  ;;  %4750 = vmatpush3.bf16.msra.mxu1 %v4747_v5  ;;  %v4891_v54 = vpack.c.bf16 %v2899_v41, %v2898_v62  ;;  %v2567_v5 = vld [vmem:[#allocation2 + $0x91] sm:$0xff]  ;;  %v6263_v62 = vld [vmem:[#allocation2 + $0xd9] sm:$0xff] }
 0x115   : > { %4752 = vmatprep.subr.bf16.mxu1 %v4751_v50  ;;  %v6270_v41 = vld [vmem:[#allocation2 + $0xf1] sm:$0xff] }
 0x116   : > { %4122 = vmatmul.mubr.f32.gmra.mrb[12].mxu1 %v6030_v12  ;;  %v2561_v12 = vld [vmem:[#allocation2 + $0x49] sm:$0xff] }
 0x117   : > { %4466 = vmatmul.mubr.f32.gmra.mrb[28].mxu0 %v6242_v40  ;;  %4124 = vmatprep.mubr.f32.mxu1 %v6032_v48  ;;  %v2900_v48 = vld [vmem:[#allocation6 + $0x420] sm:$0xff] }
 0x118   : > { %4468 = vmatprep.mubr.f32.mxu0 %v2284_v53  ;;  %4754 = vmatpush3.bf16.msra.mxu1 %v4751_v50  ;;  %v2569_v50 = vld [vmem:[#allocation2 + $0xa9] sm:$0xff]  ;;  %v2571_v53 = vld [vmem:[#allocation2 + $0xc1] sm:$0xff] }
 0x119   : > { %4756 = vmatprep.subr.bf16.mxu1 %v4755_v36 }
 0x11a   : > { %4125 = vmatmul.mubr.f32.gmra.mrb[14].mxu1 %v6040_v45  ;;  %v2562_v45 = vld [vmem:[#allocation2 + $0x51] sm:$0xff] }
 0x11b   : > { %4469 = vmatmul.mubr.f32.gmra.mrb[30].mxu0 %v5258_v29  ;;  %4127 = vmatprep.mubr.f32.mxu1 %v6042_v3  ;;  %v4895_v3 = vpack.c.bf16 %v2901_v17, %v2900_v48  ;;  %v6560_v29 = vld [vmem:[#allocation24_spill] sm:$0xff]  ;;  %v6564_v48 = vld [vmem:[#allocation17_spill] sm:$0xff]  ;;  %v6565_v17 = vld [vmem:[#allocation27_spill] sm:$0xff] }
 0x11c   : > { %4503 = vmatprep.mubr.f32.mxu0 %v2559_v61  ;;  %4758 = vmatpush3.bf16.msra.mxu1 %v4755_v36  ;;  %v2911_v61 = vld [vmem:[#allocation6 + $0x478] sm:$0xff] }
 0x11d   : > { %4919 = vmatprep.subr.bf16.mxu1 %v5666_v8 }
 0x11e   : > { %4128 = vmatmul.mubr.f32.gmra.mrb[16].mxu1 %v6050_v58  ;;  %v2564_v58 = vld [vmem:[#allocation2 + $0x69] sm:$0xff] }
 0x11f   : > { %4504 = vmatmul.mubr.f32.vlgmr.msra.gmra.mrb[0].mxu0 %v2560_v15  ;;  %4130 = vmatprep.mubr.f32.mxu1 %v6052_v10  ;;  %v4899_v10 = vpack.c.bf16 %v2903_v19, %v2902_v24  ;;  %v6562_v15 = vld [vmem:[#allocation25_spill] sm:$0xff]  ;;  %v2589_v19 = vld [vmem:[#allocation2 + $0x199] sm:$0xff] }
 0x120   : > { %4890 = vmatpush3.bf16.msra.mxu0 %v6210_v47  ;;  %4506 = vmatprep.mubr.f32.mxu0 %v2561_v12  ;;  %v2904_v47 = vld [vmem:[#allocation6 + $0x440] sm:$0xff]  ;;  %v5259_v12 = vld [vmem:[#allocation2 + $0x159] sm:$0xff] }
 0x121   : > { %4892 = vmatprep.subr.bf16.mxu0 %v4891_v54  ;;  %v4903_v25 = vpack.c.bf16 %v2905_v30, %v2904_v47  ;;  %v6573_v30 = vld [vmem:[#allocation30_spill] sm:$0xff] }
 0x122   : > { %4131 = vmatmul.mubr.f32.gmra.mrb[18].mxu1 %v6060_v28  ;;  %v2566_v28 = vld [vmem:[#allocation2 + $0x81] sm:$0xff] }
 0x123   : > { %4507 = vmatmul.mubr.f32.gmra.mrb[2].mxu0 %v2562_v45  ;;  %4133 = vmatprep.mubr.f32.mxu1 %v6064_v22  ;;  %v2906_v22 = vld [vmem:[#allocation6 + $0x450] sm:$0xff]  ;;  %v5261_v45 = vld [vmem:[#allocation2 + $0x171] sm:$0xff] }
 0x124   : > { %4509 = vmatprep.mubr.f32.mxu0 %v2563_v32  ;;  %4894 = vmatpush3.bf16.msra.mxu0 %v4891_v54  ;;  %v4907_v56 = vpack.c.bf16 %v2907_v46, %v2906_v22  ;;  %v5260_v54 = vld [vmem:[#allocation2 + $0x169] sm:$0xff]  ;;  %v6566_v32 = vld [vmem:[#allocation28_spill] sm:$0xff]  ;;  %v6575_v22 = vld [vmem:[#allocation31_spill] sm:$0xff] }
 0x125   : > { %4896 = vmatprep.subr.bf16.mxu0 %v4895_v3  ;;  %v6576_v46 = vld [vmem:[#allocation32_spill] sm:$0xff] }
 0x126   : > { %4134 = vmatmul.mubr.f32.gmra.mrb[20].mxu1 %v6074_v7  ;;  %v2568_v7 = vld [vmem:[#allocation2 + $0x99] sm:$0xff] }
 0x127   : > { %4510 = vmatmul.mubr.f32.gmra.mrb[4].mxu0 %v2564_v58  ;;  %4136 = vmatprep.mubr.f32.mxu1 %v6078_v16  ;;  %v2908_v16 = vld [vmem:[#allocation6 + $0x460] sm:$0xff] }
 0x128   : > { %4512 = vmatprep.mubr.f32.mxu0 %v2565_v11  ;;  %4898 = vmatpush3.bf16.msra.mxu0 %v4895_v3  ;;  %v4911_v36 = vpack.c.bf16 %v2909_v57, %v2908_v16  ;;  %v6567_v3 = vld [vmem:[#allocation20_spill] sm:$0xff]  ;;  %v6569_v58 = vld [vmem:[#allocation18_spill] sm:$0xff]  ;;  %v6570_v11 = vld [vmem:[#allocation29_spill] sm:$0xff] }
 0x129   : > { %4900 = vmatprep.subr.bf16.mxu0 %v4899_v10  ;;  %v6568_v24 = vmax.f32 %v6567_v3, 0.0  ;;  %v2868_v16 = vld [vmem:[#allocation2 + $0x62] sm:$0xff]  ;;  %v2869_v57 = vld [vmem:[#allocation2 + $0x6a] sm:$0xff] }
 0x12a   : > { %4137 = vmatmul.mubr.f32.gmra.mrb[22].mxu1 %v6086_v27  ;;  %v2570_v27 = vld [vmem:[#allocation2 + $0xb1] sm:$0xff] }
 0x12b   : > { %4513 = vmatmul.mubr.f32.gmra.mrb[6].mxu0 %v2566_v28  ;;  %4139 = vmatprep.mubr.f32.mxu1 %v6090_v9  ;;  %v2910_v9 = vld [vmem:[#allocation6 + $0x470] sm:$0xff] }
 0x12c   : > { %4515 = vmatprep.mubr.f32.mxu0 %v2567_v5  ;;  %4902 = vmatpush3.bf16.msra.mxu0 %v4899_v10  ;;  %v6571_v10 = vld [vmem:[#allocation21_spill] sm:$0xff]  ;;  %v2864_v5 = vld [vmem:[#allocation2 + $0x32] sm:$0xff] }
 0x12d   : > { %4904 = vmatprep.subr.bf16.mxu0 %v4903_v25  ;;  %v6572_v47 = vmax.f32 %v6571_v10, 0.0  ;;  %v2590_v28 = vld [vmem:[#allocation2 + $0x1a1] sm:$0xff] }
 0x12e   : > { %4140 = vmatmul.mubr.f32.gmra.mrb[24].mxu1 %v6098_v59  ;;  %v2572_v59 = vld [vmem:[#allocation2 + $0xc9] sm:$0xff] }
 0x12f   : > { %4516 = vmatmul.mubr.f32.gmra.mrb[8].mxu0 %v2568_v7  ;;  %4142 = vmatprep.mubr.f32.mxu1 %v6102_v63  ;;  %v4915_v63 = vpack.c.bf16 %v2911_v61, %v2910_v9  ;;  %v2865_v7 = vld [vmem:[#allocation2 + $0x3a] sm:$0xff]  ;;  %v2888_v9 = vld [vmem:[#allocation2 + $0x152] sm:$0xff] }
 0x130   : > { %4518 = vmatprep.mubr.f32.mxu0 %v2569_v50  ;;  %4906 = vmatpush3.bf16.msra.mxu0 %v4903_v25  ;;  %v6574_v25 = vld [vmem:[#allocation19_spill] sm:$0xff]  ;;  %v2866_v50 = vld [vmem:[#allocation2 + $0x4a] sm:$0xff] }
 0x131   : > { %4908 = vmatprep.subr.bf16.mxu0 %v4907_v56  ;;  %v2889_v61 = vld [vmem:[#allocation2 + $0x15a] sm:$0xff] }
 0x132   : > { %4143 = vmatmul.mubr.f32.gmra.mrb[26].mxu1 %v6110_v42  ;;  %v6268_v42 = vld [vmem:[#allocation2 + $0xe1] sm:$0xff] }
 0x133   : > { %4519 = vmatmul.mubr.f32.gmra.mrb[10].mxu0 %v2570_v27  ;;  %4145 = vmatprep.mubr.f32.mxu1 %v6114_v14  ;;  %v6276_v14 = vld [vmem:[#allocation2 + $0xf9] sm:$0xff] }
 0x134   : > { %4521 = vmatprep.mubr.f32.mxu0 %v2571_v53  ;;  %4910 = vmatpush3.bf16.msra.mxu0 %v4907_v56  ;;  %v2867_v56 = vld [vmem:[#allocation2 + $0x52] sm:$0xff]  ;;  %v2870_v27 = vld [vmem:[#allocation2 + $0x7a] sm:$0xff] }
 0x135   : > { %4912 = vmatprep.subr.bf16.mxu0 %v4911_v36  ;;  %v2872_v53 = vld [vmem:[#allocation2 + $0x92] sm:$0xff] }
 0x136   : > { %4146 = vmatmul.mubr.f32.gmra.mrb[28].mxu1 %v6122_v35  ;;  %v6278_v35 = vld [vmem:[#allocation2 + $0x109] sm:$0xff] }
 0x137   : > { %4522 = vmatmul.mubr.f32.gmra.mrb[12].mxu0 %v2572_v59  ;;  %4148 = vmatprep.mubr.f32.mxu1 %v6126_v0  ;;  %v6285_v0 = vld [vmem:[#allocation2 + $0x111] sm:$0xff] }
 0x138   : > { %4524 = vmatprep.mubr.f32.mxu0 %v6263_v62  ;;  %4914 = vmatpush3.bf16.msra.mxu0 %v4911_v36  ;;  %v2887_v36 = vld [vmem:[#allocation2 + $0x142] sm:$0xff]  ;;  %v2890_v59 = vld [vmem:[#allocation2 + $0x16a] sm:$0xff] }
 0x139   : > { %4916 = vmatprep.subr.bf16.mxu0 %v4915_v63 }
 0x13a   : > { %4149 = vmatmul.mubr.f32.gmra.mrb[30].mxu1 %v6134_v6  ;;  %v6558_v6 = vld [vmem:[#allocation15_spill] sm:$0xff] }
 0x13b   : > { %4525 = vmatmul.mubr.f32.gmra.mrb[14].mxu0 %v6268_v42  ;;  %4183 = vmatprep.mubr.f32.mxu1 %v6062_v4  ;;  %v6287_v4 = vld [vmem:[#allocation2 + $0x121] sm:$0xff] }
 0x13c   : > { %4527 = vmatprep.mubr.f32.mxu0 %v6270_v41  ;;  %4918 = vmatpush3.bf16.msra.mxu0 %v4915_v63  ;;  %v2891_v63 = vld [vmem:[#allocation2 + $0x172] sm:$0xff] }
 0x13e   : > { %4184 = vmatmul.mubr.f32.vlgmr.msra.gmra.mrb[0].mxu1 %v6070_v2  ;;  %v6294_v2 = vld [vmem:[#allocation2 + $0x129] sm:$0xff] }
 0x13f   : > { %4528 = vmatmul.mubr.f32.gmra.mrb[16].mxu0 %v6276_v14  ;;  %4927 = vmatpush3.bf16.msra.mxu1 %v5666_v8  ;;  %v6297_v8 = vld [vmem:[#allocation2 + $0x139] sm:$0xff] }
 0x140   : > { %4186 = vmatprep.mubr.f32.mxu1 %v6076_v33  ;;  %4530 = vmatprep.mubr.f32.mxu0 %v6278_v35  ;;  %v6557_v33 = vld [vmem:[#allocation22_spill] sm:$0xff] }
 0x141   : > { %4920 = vmatprep.subr.bf16.mxu1 %v5668_v13 }
 0x142   : > { %4187 = vmatmul.mubr.f32.gmra.mrb[2].mxu1 %v6083_v23  ;;  %v6304_v23 = vld [vmem:[#allocation2 + $0x141] sm:$0xff] }
 0x143   : > { %4531 = vmatmul.mubr.f32.gmra.mrb[18].mxu0 %v6285_v0  ;;  %4189 = vmatprep.mubr.f32.mxu1 %v6088_v60  ;;  %v6307_v60 = vld [vmem:[#allocation2 + $0x151] sm:$0xff] }
 0x144   : > { %4533 = vmatprep.mubr.f32.mxu0 %v6287_v4  ;;  %4928 = vmatpush3.bf16.msra.mxu1 %v5668_v13  ;;  %v6559_v13 = vld [vmem:[#allocation23_spill] sm:$0xff] }
 0x145   : > { %4921 = vmatprep.subr.bf16.mxu1 %v5673_v18 }
 0x146   : > { %4190 = vmatmul.mubr.f32.gmra.mrb[4].mxu1 %v6095_v44  ;;  %v6561_v44 = vld [vmem:[#allocation16_spill] sm:$0xff] }
 0x147   : > { %4534 = vmatmul.mubr.f32.gmra.mrb[20].mxu0 %v6294_v2  ;;  %4192 = vmatprep.mubr.f32.mxu1 %v6557_v33 }
 0x148   : > { %4536 = vmatprep.mubr.f32.mxu0 %v6297_v8  ;;  %4929 = vmatpush3.bf16.msra.mxu1 %v5673_v18  ;;  %v6563_v18 = vld [vmem:[#allocation26_spill] sm:$0xff] }
 0x149   : > { %4922 = vmatprep.subr.bf16.mxu1 %v6558_v6 }
 0x14a   : > { %4193 = vmatmul.mubr.f32.gmra.mrb[6].mxu1 %v6559_v13 }
 0x14b   : > { %4537 = vmatmul.mubr.f32.gmra.mrb[22].mxu0 %v6304_v23  ;;  %4195 = vmatprep.mubr.f32.mxu1 %v6560_v29 }
 0x14c   : > { %4539 = vmatprep.mubr.f32.mxu0 %v6307_v60  ;;  %4930 = vmatpush3.bf16.msra.mxu1 %v6558_v6 }
 0x14d   : > { %4923 = vmatprep.subr.bf16.mxu1 %v6561_v44 }
 0x14e   : > { %4196 = vmatmul.mubr.f32.gmra.mrb[8].mxu1 %v6562_v15 }
 0x14f   : > { %4540 = vmatmul.mubr.f32.gmra.mrb[24].mxu0 %v5259_v12  ;;  %4198 = vmatprep.mubr.f32.mxu1 %v6563_v18 }
 0x150   : > { %4542 = vmatprep.mubr.f32.mxu0 %v5260_v54  ;;  %4931 = vmatpush3.bf16.msra.mxu1 %v6561_v44 }
 0x151   : > { %4924 = vmatprep.subr.bf16.mxu1 %v6564_v48 }
 0x152   : > { %4199 = vmatmul.mubr.f32.gmra.mrb[10].mxu1 %v6565_v17 }
 0x153   : > { %4543 = vmatmul.mubr.f32.gmra.mrb[26].mxu0 %v5261_v45  ;;  %4201 = vmatprep.mubr.f32.mxu1 %v6566_v32 }
 0x154   : > { %4545 = vmatprep.mubr.f32.mxu0 %v6568_v24  ;;  %4932 = vmatpush3.bf16.msra.mxu1 %v6564_v48 }
 0x155   : > { %4925 = vmatprep.subr.bf16.mxu1 %v6569_v58 }
 0x156   : > { %4202 = vmatmul.mubr.f32.gmra.mrb[12].mxu1 %v6570_v11 }
 0x157   : > { %4546 = vmatmul.mubr.f32.gmra.mrb[28].mxu0 %v6572_v47  ;;  %4204 = vmatprep.mubr.f32.mxu1 %v6573_v30 }
 0x158   : > { %4548 = vmatprep.mubr.f32.mxu0 %v2589_v19  ;;  %4933 = vmatpush3.bf16.msra.mxu1 %v6569_v58 }
 0x159   : > { %4926 = vmatprep.subr.bf16.mxu1 %v6574_v25 }
 0x15a   : > { %4205 = vmatmul.mubr.f32.gmra.mrb[14].mxu1 %v6575_v22 }
 0x15b   : > { %4549 = vmatmul.mubr.f32.gmra.mrb[30].mxu0 %v2590_v28  ;;  %4207 = vmatprep.mubr.f32.mxu1 %v6576_v46 }
 0x15c   : > { %4583 = vmatprep.mubr.f32.mxu0 %v2864_v5  ;;  %4934 = vmatpush3.bf16.msra.mxu1 %v6574_v25 }
 0x15e   : > { %4208 = vmatmul.mubr.f32.gmra.mrb[16].mxu1 %v6158_v21  ;;  %v2871_v21 = vld [vmem:[#allocation2 + $0x82] sm:$0xff] }
 0x15f   : > { %4584 = vmatmul.mubr.f32.vlgmr.msra.gmra.mrb[0].mxu0 %v2865_v7  ;;  %4210 = vmatprep.mubr.f32.mxu1 %v6162_v20  ;;  %v2874_v20 = vld [vmem:[#allocation2 + $0xaa] sm:$0xff] }
 0x160   : > { %4586 = vmatprep.mubr.f32.mxu0 %v2866_v50 }
 0x162   : > { %4211 = vmatmul.mubr.f32.gmra.mrb[18].mxu1 %v6167_v49  ;;  %v2873_v49 = vld [vmem:[#allocation2 + $0x9a] sm:$0xff] }
 0x163   : > { %4587 = vmatmul.mubr.f32.gmra.mrb[2].mxu0 %v2867_v56  ;;  %4213 = vmatprep.mubr.f32.mxu1 %v6170_v31  ;;  %v2876_v31 = vld [vmem:[#allocation2 + $0xc2] sm:$0xff] }
 0x164   : > { %4589 = vmatprep.mubr.f32.mxu0 %v2868_v16 }
 0x166   : > { %4214 = vmatmul.mubr.f32.gmra.mrb[20].mxu1 %v6175_v37  ;;  %v2875_v37 = vld [vmem:[#allocation2 + $0xb2] sm:$0xff] }
 0x167   : > { %4590 = vmatmul.mubr.f32.gmra.mrb[4].mxu0 %v2869_v57  ;;  %4216 = vmatprep.mubr.f32.mxu1 %v6178_v26  ;;  %v2877_v26 = vld [vmem:[#allocation2 + $0xca] sm:$0xff] }
 0x168   : > { %4592 = vmatprep.mubr.f32.mxu0 %v2870_v27 }
 0x16a   : > { %4217 = vmatmul.mubr.f32.gmra.mrb[22].mxu1 %v6183_v43  ;;  %v2878_v43 = vld [vmem:[#allocation2 + $0xda] sm:$0xff] }
 0x16b   : > { %4593 = vmatmul.mubr.f32.gmra.mrb[6].mxu0 %v2871_v21  ;;  %4219 = vmatprep.mubr.f32.mxu1 %v6186_v51  ;;  %v2879_v51 = vld [vmem:[#allocation2 + $0xe2] sm:$0xff] }
 0x16c   : > { %4595 = vmatprep.mubr.f32.mxu0 %v2872_v53 }
 0x16e   : > { %4220 = vmatmul.mubr.f32.gmra.mrb[24].mxu1 %v6191_v1  ;;  %v2880_v1 = vld [vmem:[#allocation2 + $0xf2] sm:$0xff] }
 0x16f   : > { %4596 = vmatmul.mubr.f32.gmra.mrb[8].mxu0 %v2873_v49  ;;  %4222 = vmatprep.mubr.f32.mxu1 %v6194_v55  ;;  %v2881_v55 = vld [vmem:[#allocation2 + $0xfa] sm:$0xff] }
 0x170   : > { %4598 = vmatprep.mubr.f32.mxu0 %v2874_v20 }
 0x172   : > { %4223 = vmatmul.mubr.f32.gmra.mrb[26].mxu1 %v6199_v39  ;;  %v2882_v39 = vld [vmem:[#allocation2 + $0x10a] sm:$0xff] }
 0x173   : > { %4599 = vmatmul.mubr.f32.gmra.mrb[10].mxu0 %v2875_v37  ;;  %4225 = vmatprep.mubr.f32.mxu1 %v6202_v52  ;;  %v2883_v52 = vld [vmem:[#allocation2 + $0x112] sm:$0xff] }
 0x174   : > { %4601 = vmatprep.mubr.f32.mxu0 %v2876_v31 }
 0x176   : > { %4226 = vmatmul.mubr.f32.gmra.mrb[28].mxu1 %v6207_v34  ;;  %v2884_v34 = vld [vmem:[#allocation2 + $0x122] sm:$0xff] }
 0x177   : > { %4602 = vmatmul.mubr.f32.gmra.mrb[12].mxu0 %v2877_v26  ;;  %4228 = vmatprep.mubr.f32.mxu1 %v6236_v38  ;;  %v2885_v38 = vld [vmem:[#allocation2 + $0x12a] sm:$0xff] }
 0x178   : > { %4604 = vmatprep.mubr.f32.mxu0 %v2878_v43 }
 0x17a   : > { %4229 = vmatmul.mubr.f32.gmra.mrb[30].mxu1 %v6242_v40  ;;  %v2886_v40 = vld [vmem:[#allocation2 + $0x13a] sm:$0xff] }
 0x17b   : > { %4605 = vmatmul.mubr.f32.gmra.mrb[14].mxu0 %v2879_v51  ;;  %4287 = vmatprep.mubr.f32.mxu1 %v6263_v62  ;;  %v1670_v62 = vld [vmem:[#allocation2 + $0x159] sm:$0xff] }
 0x17c   : > { %4607 = vmatprep.mubr.f32.mxu0 %v2880_v1 }
 0x17e   : > { %4288 = vmatmul.mubr.f32.vlgmr.msra.gmra.mrb[16].mxu1 %v6268_v42  ;;  %v1671_v42 = vld [vmem:[#allocation2 + $0x169] sm:$0xff] }
 0x17f   : > { %4608 = vmatmul.mubr.f32.gmra.mrb[16].mxu0 %v2881_v55  ;;  %4290 = vmatprep.mubr.f32.mxu1 %v6270_v41  ;;  %v2892_v41 = vld [vmem:[#allocation2 + $0x182] sm:$0xff] }
 0x180   : > { %4610 = vmatprep.mubr.f32.mxu0 %v2882_v39 }
 0x182   : > { %4291 = vmatmul.mubr.f32.gmra.mrb[18].mxu1 %v6276_v14  ;;  %v1672_v14 = vld [vmem:[#allocation2 + $0x171] sm:$0xff] }
 0x183   : > { %4611 = vmatmul.mubr.f32.gmra.mrb[18].mxu0 %v2883_v52  ;;  %4293 = vmatprep.mubr.f32.mxu1 %v6278_v35  ;;  %v2893_v35 = vld [vmem:[#allocation2 + $0x18a] sm:$0xff] }
 0x184   : > { %4613 = vmatprep.mubr.f32.mxu0 %v2884_v34 }
 0x186   : > { %4294 = vmatmul.mubr.f32.gmra.mrb[20].mxu1 %v6285_v0  ;;  %v1673_v0 = vld [vmem:[#allocation2 + $0x181] sm:$0xff] }
 0x187   : > { %4614 = vmatmul.mubr.f32.gmra.mrb[20].mxu0 %v2885_v38  ;;  %4296 = vmatprep.mubr.f32.mxu1 %v6287_v4  ;;  %v2894_v4 = vld [vmem:[#allocation2 + $0x19a] sm:$0xff] }
 0x188   : > { %4616 = vmatprep.mubr.f32.mxu0 %v2886_v40 }
 0x18a   : > { %4297 = vmatmul.mubr.f32.gmra.mrb[22].mxu1 %v6294_v2  ;;  %v1674_v2 = vld [vmem:[#allocation2 + $0x189] sm:$0xff] }
 0x18b   : > { %4617 = vmatmul.mubr.f32.gmra.mrb[22].mxu0 %v2887_v36  ;;  %4299 = vmatprep.mubr.f32.mxu1 %v6297_v8  ;;  %v2895_v8 = vld [vmem:[#allocation2 + $0x1a2] sm:$0xff] }
 0x18c   : > { %4619 = vmatprep.mubr.f32.mxu0 %v2888_v9 }
 0x18e   : > { %4300 = vmatmul.mubr.f32.gmra.mrb[24].mxu1 %v6304_v23 }
 0x18f   : > { %4620 = vmatmul.mubr.f32.gmra.mrb[24].mxu0 %v2889_v61  ;;  %4302 = vmatprep.mubr.f32.mxu1 %v6307_v60 }
 0x190   : > { %4622 = vmatprep.mubr.f32.mxu0 %v2890_v59 }
 0x192   : > { %4303 = vmatmul.mubr.f32.gmra.mrb[26].mxu1 %v1670_v62 }
 0x193   : > { %4623 = vmatmul.mubr.f32.gmra.mrb[26].mxu0 %v2891_v63  ;;  %4305 = vmatprep.mubr.f32.mxu1 %v1671_v42 }
 0x194   : > { %4625 = vmatprep.mubr.f32.mxu0 %v2892_v41 }
 0x196   : > { %4306 = vmatmul.mubr.f32.gmra.mrb[28].mxu1 %v1672_v14 }
 0x197   : > { %4626 = vmatmul.mubr.f32.gmra.mrb[28].mxu0 %v2893_v35  ;;  %4308 = vmatprep.mubr.f32.mxu1 %v1673_v0 }
 0x198   : > { %4628 = vmatprep.mubr.f32.mxu0 %v2894_v4 }
 0x19a   : > { %4309 = vmatmul.mubr.f32.gmra.mrb[30].mxu1 %v1674_v2 }
 0x19b   : > { %4629 = vmatmul.mubr.f32.gmra.mrb[30].mxu0 %v2895_v8 }
 0x211   : > { %v4185_v33 = vpop.f32.mrb[0].mxu1 }
 0x212   : > { %v1452_v23 = vpop.f32.mrb[1].mxu1 }
 0x215   : > { %v4188_v60 = vpop.f32.mrb[2].mxu1 }
 0x216   : > { %v1462_v6 = vpop.f32.mrb[3].mxu1 }
 0x219   : > { %v4191_v13 = vpop.f32.mrb[4].mxu1 }
 0x21a   : > { %v1472_v29 = vpop.f32.mrb[5].mxu1 }
 0x21d   : > { %v4194_v44 = vpop.f32.mrb[6].mxu1 }
 0x21e   : > { %v1482_v15 = vpop.f32.mrb[7].mxu1 }
 0x221   : > { %v4197_v12 = vpop.f32.mrb[8].mxu1 }
 0x222   : > { %v1492_v18 = vpop.f32.mrb[9].mxu1 }
 0x225   : > { %v4200_v54 = vpop.f32.mrb[10].mxu1 }
 0x226   : > { %v6361_v48 = vpop.f32.mrb[11].mxu1 }
 0x229   : > { %v6363_v17 = vpop.f32.mrb[12].mxu1 }
 0x22a   : > { %v6365_v45 = vpop.f32.mrb[13].mxu1 }
 0x22d   : > { %v6367_v32 = vpop.f32.mrb[14].mxu1 }
 0x22e   : > { %v6369_v3 = vpop.f32.mrb[15].mxu1 }
 0x232   : > { %v4585_v24 = vpop.f32.mrb[0].mxu0 }
 0x233   : > { %v4935_v19 = vadd.f32 %v4585_v24, %v4185_v33  ;;  %v2978_v58 = vpop.f32.mrb[1].mxu0 }
 0x234   : > { %v4936_v11 = vadd.f32 %v2978_v58, %v1452_v23 }
 0x235   : > { %3170 = vst [vmem:[%s6373_s14 + $0x8] sm:$0xff] %v4935_v19  ;;  %v3240_v10 = vmul.f32 %v4935_v19, %v4935_v19 }
 0x236   : > { %3169 = vst [vmem:[%s6373_s14] sm:$0xff] %v4936_v11  ;;  %v3201_v47 = vadd.f32 %v4936_v11, %v4935_v19  ;;  %v3239_v30 = vmul.f32 %v4936_v11, %v4936_v11  ;;  %v4588_v28 = vpop.f32.mrb[2].mxu0 }
 0x237   : > { %v4937_v5 = vadd.f32 %v4588_v28, %v4188_v60  ;;  %v2988_v25 = vpop.f32.mrb[3].mxu0 }
 0x238   : > { %v3271_v22 = vadd.f32 %v3240_v10, %v3239_v30  ;;  %v4938_v46 = vadd.f32 %v2988_v25, %v1462_v6 }
 0x239   : > { %3172 = vst [vmem:[%s6373_s14 + $0x18] sm:$0xff] %v4937_v5  ;;  %v3242_v27 = vmul.f32 %v4937_v5, %v4937_v5 }
 0x23a   : > { %3171 = vst [vmem:[%s6373_s14 + $0x10] sm:$0xff] %v4938_v46  ;;  %v3202_v7 = vadd.f32 %v4938_v46, %v3201_v47  ;;  %v3241_v50 = vmul.f32 %v4938_v46, %v4938_v46  ;;  %v4591_v56 = vpop.f32.mrb[4].mxu0 }
 0x23b   : > { %v4939_v16 = vadd.f32 %v4591_v56, %v4191_v13  ;;  %v2998_v57 = vpop.f32.mrb[5].mxu0 }
 0x23c   : > { %v3272_v21 = vadd.f32 %v3271_v22, %v3241_v50  ;;  %v4940_v53 = vadd.f32 %v2998_v57, %v1472_v29  ;;  %v3203_v49 = vadd.f32 %v4937_v5, %v3202_v7 }
 0x23d   : > { %3174 = vst [vmem:[%s6373_s14 + $0x28] sm:$0xff] %v4939_v16  ;;  %v3244_v1 = vmul.f32 %v4939_v16, %v4939_v16 }
 0x23e   : > { %3173 = vst [vmem:[%s6373_s14 + $0x20] sm:$0xff] %v4940_v53  ;;  %v3204_v20 = vadd.f32 %v4940_v53, %v3203_v49  ;;  %v3243_v37 = vmul.f32 %v4940_v53, %v4940_v53  ;;  %v3273_v31 = vadd.f32 %v3272_v21, %v3242_v27  ;;  %v4594_v26 = vpop.f32.mrb[6].mxu0 }
 0x23f   : > { %v4941_v43 = vadd.f32 %v4594_v26, %v4194_v44  ;;  %v3008_v51 = vpop.f32.mrb[7].mxu0 }
 0x240   : > { %v3274_v55 = vadd.f32 %v3273_v31, %v3243_v37  ;;  %v4942_v39 = vadd.f32 %v3008_v51, %v1482_v15  ;;  %v3205_v52 = vadd.f32 %v4939_v16, %v3204_v20 }
 0x241   : > { %3176 = vst [vmem:[%s6373_s14 + $0x38] sm:$0xff] %v4941_v43  ;;  %v3246_v59 = vmul.f32 %v4941_v43, %v4941_v43 }
 0x242   : > { %3175 = vst [vmem:[%s6373_s14 + $0x30] sm:$0xff] %v4942_v39  ;;  %v3206_v34 = vadd.f32 %v4942_v39, %v3205_v52  ;;  %v3245_v38 = vmul.f32 %v4942_v39, %v4942_v39  ;;  %v3275_v40 = vadd.f32 %v3274_v55, %v3244_v1  ;;  %v4597_v36 = vpop.f32.mrb[8].mxu0 }
 0x243   : > { %v4943_v9 = vadd.f32 %v4597_v36, %v4197_v12  ;;  %v3018_v61 = vpop.f32.mrb[9].mxu0 }
 0x244   : > { %v3276_v62 = vadd.f32 %v3275_v40, %v3245_v38  ;;  %v4944_v63 = vadd.f32 %v3018_v61, %v1492_v18  ;;  %v3207_v42 = vadd.f32 %v4941_v43, %v3206_v34 }
 0x245   : > { %3178 = vst [vmem:[%s6373_s14 + $0x48] sm:$0xff] %v4943_v9  ;;  %v3248_v8 = vmul.f32 %v4943_v9, %v4943_v9 }
 0x246   : > { %3177 = vst [vmem:[%s6373_s14 + $0x40] sm:$0xff] %v4944_v63  ;;  %v3208_v41 = vadd.f32 %v4944_v63, %v3207_v42  ;;  %v3247_v14 = vmul.f32 %v4944_v63, %v4944_v63  ;;  %v3277_v35 = vadd.f32 %v3276_v62, %v3246_v59  ;;  %v4600_v0 = vpop.f32.mrb[10].mxu0 }
 0x247   : > { %v4945_v4 = vadd.f32 %v4600_v0, %v4200_v54  ;;  %v3028_v2 = vpop.f32.mrb[11].mxu0 }
 0x248   : > { %v3278_v33 = vadd.f32 %v3277_v35, %v3247_v14  ;;  %v4946_v23 = vadd.f32 %v3028_v2, %v6361_v48  ;;  %v3209_v60 = vadd.f32 %v4943_v9, %v3208_v41 }
 0x249   : > { %3180 = vst [vmem:[%s6373_s14 + $0x58] sm:$0xff] %v4945_v4  ;;  %v3250_v18 = vmul.f32 %v4945_v4, %v4945_v4 }
 0x24a   : > { %3179 = vst [vmem:[%s6373_s14 + $0x50] sm:$0xff] %v4946_v23  ;;  %v3210_v6 = vadd.f32 %v4946_v23, %v3209_v60  ;;  %v3249_v13 = vmul.f32 %v4946_v23, %v4946_v23  ;;  %v3279_v29 = vadd.f32 %v3278_v33, %v3248_v8  ;;  %v4603_v44 = vpop.f32.mrb[12].mxu0 }
 0x24b   : > { %v4947_v15 = vadd.f32 %v4603_v44, %v6363_v17  ;;  %v3038_v12 = vpop.f32.mrb[13].mxu0 }
 0x24c   : > { %v3280_v54 = vadd.f32 %v3279_v29, %v3249_v13  ;;  %v4948_v24 = vadd.f32 %v3038_v12, %v6365_v45  ;;  %v3211_v19 = vadd.f32 %v4945_v4, %v3210_v6 }
 0x24d   : > { %3182 = vst [vmem:[%s6373_s14 + $0x68] sm:$0xff] %v4947_v15  ;;  %v3252_v28 = vmul.f32 %v4947_v15, %v4947_v15 }
 0x24e   : > { %3181 = vst [vmem:[%s6373_s14 + $0x60] sm:$0xff] %v4948_v24  ;;  %v3212_v48 = vadd.f32 %v4948_v24, %v3211_v19  ;;  %v3251_v58 = vmul.f32 %v4948_v24, %v4948_v24  ;;  %v3281_v11 = vadd.f32 %v3280_v54, %v3250_v18  ;;  %v4606_v10 = vpop.f32.mrb[14].mxu0 }
 0x24f   : > { %v4949_v47 = vadd.f32 %v4606_v10, %v6367_v32  ;;  %v3048_v30 = vpop.f32.mrb[15].mxu0 }
 0x250   : > { %v3282_v5 = vadd.f32 %v3281_v11, %v3251_v58  ;;  %v4950_v17 = vadd.f32 %v3048_v30, %v6369_v3  ;;  %v3213_v25 = vadd.f32 %v4947_v15, %v3212_v48 }
 0x251   : > { %3184 = vst [vmem:[%s6373_s14 + $0x78] sm:$0xff] %v4949_v47  ;;  %v4289_v45 = vpop.f32.mrb[16].mxu1  ;;  %v3254_v27 = vmul.f32 %v4949_v47, %v4949_v47 }
 0x252   : > { %3183 = vst [vmem:[%s6373_s14 + $0x70] sm:$0xff] %v4950_v17  ;;  %v3214_v22 = vadd.f32 %v4950_v17, %v3213_v25  ;;  %v3253_v46 = vmul.f32 %v4950_v17, %v4950_v17  ;;  %v3283_v7 = vadd.f32 %v3282_v5, %v3252_v28  ;;  %v4609_v50 = vpop.f32.mrb[16].mxu0  ;;  %v1837_v56 = vpop.f32.mrb[17].mxu1 }
 0x253   : > { %v4951_v16 = vadd.f32 %v4609_v50, %v4289_v45  ;;  %v3058_v57 = vpop.f32.mrb[17].mxu0 }
 0x254   : > { %v3284_v32 = vadd.f32 %v3283_v7, %v3253_v46  ;;  %v4952_v21 = vadd.f32 %v3058_v57, %v1837_v56  ;;  %v3215_v53 = vadd.f32 %v4949_v47, %v3214_v22 }
 0x255   : > { %3186 = vst [vmem:[%s6373_s14 + $0x88] sm:$0xff] %v4951_v16  ;;  %v4292_v3 = vpop.f32.mrb[18].mxu1  ;;  %v3256_v1 = vmul.f32 %v4951_v16, %v4951_v16 }
 0x256   : > { %3185 = vst [vmem:[%s6373_s14 + $0x80] sm:$0xff] %v4952_v21  ;;  %v3216_v49 = vadd.f32 %v4952_v21, %v3215_v53  ;;  %v3255_v20 = vmul.f32 %v4952_v21, %v4952_v21  ;;  %v3285_v37 = vadd.f32 %v3284_v32, %v3254_v27  ;;  %v4612_v31 = vpop.f32.mrb[18].mxu0  ;;  %v1847_v26 = vpop.f32.mrb[19].mxu1 }
 0x257   : > { %v4953_v43 = vadd.f32 %v4612_v31, %v4292_v3  ;;  %v3068_v51 = vpop.f32.mrb[19].mxu0 }
 0x258   : > { %v3286_v55 = vadd.f32 %v3285_v37, %v3255_v20  ;;  %v4954_v39 = vadd.f32 %v3068_v51, %v1847_v26  ;;  %v3217_v52 = vadd.f32 %v4951_v16, %v3216_v49 }
 0x259   : > { %3188 = vst [vmem:[%s6373_s14 + $0x98] sm:$0xff] %v4953_v43  ;;  %v4295_v34 = vpop.f32.mrb[20].mxu1  ;;  %v3258_v63 = vmul.f32 %v4953_v43, %v4953_v43 }
 0x25a   : > { %3187 = vst [vmem:[%s6373_s14 + $0x90] sm:$0xff] %v4954_v39  ;;  %v3218_v38 = vadd.f32 %v4954_v39, %v3217_v52  ;;  %v3257_v40 = vmul.f32 %v4954_v39, %v4954_v39  ;;  %v3287_v36 = vadd.f32 %v3286_v55, %v3256_v1  ;;  %v4615_v9 = vpop.f32.mrb[20].mxu0  ;;  %v1857_v61 = vpop.f32.mrb[21].mxu1 }
 0x25b   : > { %v4955_v59 = vadd.f32 %v4615_v9, %v4295_v34  ;;  %v3078_v62 = vpop.f32.mrb[21].mxu0 }
 0x25c   : > { %v3288_v42 = vadd.f32 %v3287_v36, %v3257_v40  ;;  %v4956_v41 = vadd.f32 %v3078_v62, %v1857_v61  ;;  %v3219_v14 = vadd.f32 %v4953_v43, %v3218_v38 }
 0x25d   : > { %3190 = vst [vmem:[%s6373_s14 + $0xa8] sm:$0xff] %v4955_v59  ;;  %v4298_v35 = vpop.f32.mrb[22].mxu1  ;;  %v3260_v6 = vmul.f32 %v4955_v59, %v4955_v59 }
 0x25e   : > { %3189 = vst [vmem:[%s6373_s14 + $0xa0] sm:$0xff] %v4956_v41  ;;  %v3220_v0 = vadd.f32 %v4956_v41, %v3219_v14  ;;  %v3259_v4 = vmul.f32 %v4956_v41, %v4956_v41  ;;  %v3289_v2 = vadd.f32 %v3288_v42, %v3258_v63  ;;  %v4618_v8 = vpop.f32.mrb[22].mxu0  ;;  %v1867_v33 = vpop.f32.mrb[23].mxu1 }
 0x25f   : > { %v4957_v23 = vadd.f32 %v4618_v8, %v4298_v35  ;;  %v3088_v60 = vpop.f32.mrb[23].mxu0 }
 0x260   : > { %v3290_v13 = vadd.f32 %v3289_v2, %v3259_v4  ;;  %v4958_v29 = vadd.f32 %v3088_v60, %v1867_v33  ;;  %v3221_v44 = vadd.f32 %v4955_v59, %v3220_v0 }
 0x261   : > { %3192 = vst [vmem:[%s6373_s14 + $0xb8] sm:$0xff] %v4957_v23  ;;  %v4301_v15 = vpop.f32.mrb[24].mxu1  ;;  %v3262_v11 = vmul.f32 %v4957_v23, %v4957_v23 }
 0x262   : > { %3191 = vst [vmem:[%s6373_s14 + $0xb0] sm:$0xff] %v4958_v29  ;;  %v3222_v12 = vadd.f32 %v4958_v29, %v3221_v44  ;;  %v3261_v18 = vmul.f32 %v4958_v29, %v4958_v29  ;;  %v3291_v54 = vadd.f32 %v3290_v13, %v3260_v6  ;;  %v4621_v24 = vpop.f32.mrb[24].mxu0  ;;  %v1877_v19 = vpop.f32.mrb[25].mxu1 }
 0x263   : > { %v4959_v48 = vadd.f32 %v4621_v24, %v4301_v15  ;;  %v3098_v58 = vpop.f32.mrb[25].mxu0 }
 0x264   : > { %v3292_v10 = vadd.f32 %v3291_v54, %v3261_v18  ;;  %v4960_v47 = vadd.f32 %v3098_v58, %v1877_v19  ;;  %v3223_v30 = vadd.f32 %v4957_v23, %v3222_v12 }
 0x265   : > { %3194 = vst [vmem:[%s6373_s14 + $0xc8] sm:$0xff] %v4959_v48  ;;  %v4304_v28 = vpop.f32.mrb[26].mxu1  ;;  %v3264_v50 = vmul.f32 %v4959_v48, %v4959_v48 }
 0x266   : > { %3193 = vst [vmem:[%s6373_s14 + $0xc0] sm:$0xff] %v4960_v47  ;;  %v3224_v5 = vadd.f32 %v4960_v47, %v3223_v30  ;;  %v3263_v17 = vmul.f32 %v4960_v47, %v4960_v47  ;;  %v3293_v25 = vadd.f32 %v3292_v10, %v3262_v11  ;;  %v4624_v45 = vpop.f32.mrb[26].mxu0  ;;  %v1887_v22 = vpop.f32.mrb[27].mxu1 }
 0x267   : > { %v4961_v46 = vadd.f32 %v4624_v45, %v4304_v28  ;;  %v3108_v7 = vpop.f32.mrb[27].mxu0 }
 0x268   : > { %v3294_v56 = vadd.f32 %v3293_v25, %v3263_v17  ;;  %v4962_v16 = vadd.f32 %v3108_v7, %v1887_v22  ;;  %v3225_v57 = vadd.f32 %v4959_v48, %v3224_v5 }
 0x269   : > { %3196 = vst [vmem:[%s6373_s14 + $0xd8] sm:$0xff] %v4961_v46  ;;  %v4307_v27 = vpop.f32.mrb[28].mxu1  ;;  %v3266_v31 = vmul.f32 %v4961_v46, %v4961_v46 }
 0x26a   : > { %3195 = vst [vmem:[%s6373_s14 + $0xd0] sm:$0xff] %v4962_v16  ;;  %v3226_v32 = vadd.f32 %v4962_v16, %v3225_v57  ;;  %v3265_v21 = vmul.f32 %v4962_v16, %v4962_v16  ;;  %v3295_v53 = vadd.f32 %v3294_v56, %v3264_v50  ;;  %v4627_v3 = vpop.f32.mrb[28].mxu0  ;;  %v1897_v49 = vpop.f32.mrb[29].mxu1 }
 0x26b   : > { %v4963_v20 = vadd.f32 %v4627_v3, %v4307_v27  ;;  %v3118_v37 = vpop.f32.mrb[29].mxu0 }
 0x26c   : > { %v3296_v26 = vadd.f32 %v3295_v53, %v3265_v21  ;;  %v4964_v43 = vadd.f32 %v3118_v37, %v1897_v49  ;;  %v3227_v51 = vadd.f32 %v4961_v46, %v3226_v32 }
 0x26d   : > { %3198 = vst [vmem:[%s6373_s14 + $0xe8] sm:$0xff] %v4963_v20  ;;  %v4310_v1 = vpop.f32.mrb[30].mxu1  ;;  %v3268_v9 = vmul.f32 %v4963_v20, %v4963_v20 }
 0x26e   : > { %3197 = vst [vmem:[%s6373_s14 + $0xe0] sm:$0xff] %v4964_v43  ;;  %v3228_v55 = vadd.f32 %v4964_v43, %v3227_v51  ;;  %v3267_v39 = vmul.f32 %v4964_v43, %v4964_v43  ;;  %v3297_v52 = vadd.f32 %v3296_v26, %v3266_v31  ;;  %v4630_v34 = vpop.f32.mrb[30].mxu0  ;;  %v1907_v38 = vpop.f32.mrb[31].mxu1 }
 0x26f   : > { %v4965_v40 = vadd.f32 %v4630_v34, %v4310_v1  ;;  %v3128_v36 = vpop.f32.mrb[31].mxu0 }
 0x270   : > { %v3298_v61 = vadd.f32 %v3297_v52, %v3267_v39  ;;  %v4966_v59 = vadd.f32 %v3128_v36, %v1907_v38  ;;  %v3229_v62 = vadd.f32 %v4963_v20, %v3228_v55 }
 0x271   : > { %3200 = vst [vmem:[%s6373_s14 + $0xf8] sm:$0xff] %v4965_v40 }
 0x272   : > { %3199 = vst [vmem:[%s6373_s14 + $0xf0] sm:$0xff] %v4966_v59  ;;  %v3230_v63 = vadd.f32 %v4966_v59, %v3229_v62  ;;  %v3269_v42 = vmul.f32 %v4966_v59, %v4966_v59  ;;  %v3299_v41 = vadd.f32 %v3298_v61, %v3268_v9 }
 0x273   : > { %5333 = shalt.err (!%p5330_p7)
}
 0x274   : > { %s5334_s24 = scalar_lea.hbm %s6415_s28, 4096  ;;  %s5338_s17 = scalar_lea.hbm %s6498_s4, 8192 }
 0x275   : > { %p5335_p9 = scmp.ne.s32.totalorder %s6415_s28, %s5334_s24  ;;  %p5339_p5 = scmp.lt.u32.totalorder %s6415_s28, %s6498_s4 }
 0x276   : > { %p5340_p11 = scmp.lt.u32.totalorder %s5338_s17, %s5334_s24  ;;  %p5342_p4 = scmp.lt.u32.totalorder %s5334_s24, %s6415_s28 }
 0x277   : > { %p5336_p1 = pnand %p5335_p9, %p5557_p12 }
 0x278   : > { %p5341_p2 = por %p5340_p11, %p5339_p5 }
 0x279   : > { %p5337_p0 = pneg %p5336_p1 }
 0x27a   : > { %p5343_p6 = por %p5342_p4, %p5341_p2 }
 0x27c   : > { %p5344_p8 = pnand %p5343_p6, %p5337_p0 }
 0x27e   : > { %5347 = shalt.err (!%p5344_p8)
}
 0x27f   : > { %s5430_s13 = smov 128   ;;  %s5431_s29 = smov 8   ;;  %v3270_v14 = vmul.f32 %v4965_v40, %v4965_v40  ;;  %v3231_v35 = vadd.f32 %v4965_v40, %v3230_v63  ;;  %v3300_v0 = vadd.f32 %v3299_v41, %v3269_v42 }
 0x280   : > { %5197 = dma.vmem_to_hbm [thread:$0]  (%p5557_p12), %s6417_s15, 4096, %s6415_s28, %s3310_s27, %s5430_s13, %s5430_s13, %s5431_s29  }
 0x281   : > { %v3232_v4 = vrot.slane %v3231_v35, 4  ;;  %v3301_v2 = vadd.f32 %v3300_v0, %v3270_v14  ;;  %s3467_s10 = sshll.u32 %s5608_s23, 1  ;;  %s3474_s11 = sshll.u32 %s5484_s22, 5 }
 0x282   : > { %s268_s12 = scalar_lea.vmem [#allocation9], %s3467_s10  ;;  %s6450_s27 = scalar_lea.hbm %s6499_s5, %s3474_s11 }
 0x283   : > { %v3233_v8 = vadd.f32 %v3232_v4, %v3231_v35  ;;  %v3302_v33 = vrot.slane %v3301_v2, 4  ;;  %s3344_s7 = sshll.u32 %s268_s12, 4  ;;  %s3315_s24 = scalar_lea.sflag [#allocation10], %s5608_s23  ;;  %s6452_s7 = int_to_ptr.vmem [resolvable:$true] %s3344_s7 }
 0x284   : > { %s5348_s26 = scalar_lea.vmem %s6452_s7, 32  ;;  %s5432_s22 = smov [#allocation9]  }
 0x285   : > { %v3234_v23 = vrot.slane %v3233_v8, 2  ;;  %v3303_v60 = vadd.f32 %v3302_v33, %v3301_v2  ;;  %p5349_p10 = scmp.ne.s32.totalorder %s6452_s7, %s5348_s26  ;;  %s5352_s16 = sshll.u32 %s5432_s22, 4  ;;  %s5353_s16 = int_to_ptr.vmem [resolvable:$false] %s5352_s16 }
 0x286   : > { %s5354_s17 = scalar_lea.vmem %s5353_s16, 64  ;;  %p5355_p7 = scmp.lt.s32.totalorder %s6452_s7, %s5353_s16 }
 0x287   : > { %v3235_v6 = vadd.f32 %v3234_v23, %v3233_v8  ;;  %v3304_v13 = vrot.slane %v3303_v60, 2  ;;  %p5350_p13 = pnand %p5349_p10, %p5557_p12  ;;  %p5356_p9 = scmp.lt.s32.totalorder %s5354_s17, %s5348_s26 }
 0x289   : > { %v3236_v29 = vrot.slane %v3235_v6, 1  ;;  %v3305_v44 = vadd.f32 %v3304_v13, %v3303_v60  ;;  %p5351_p3 = pneg %p5350_p13  ;;  %p5357_p1 = por %p5356_p9, %p5355_p7 }
 0x28b   : > { %v3237_v15 = vadd.f32 %v3236_v29, %v3235_v6  ;;  %v3306_v12 = vrot.slane %v3305_v44, 1  ;;  %p5358_p0 = pnand %p5357_p1, %p5351_p3 }
 0x28d   : > { %3238 = vst [vmem:[%s268_s12] sm:$0x1] %v3237_v15  ;;  %v3307_v18 = vadd.f32 %v3306_v12, %v3305_v44 }
 0x28f   : > { %3308 = vst [vmem:[%s268_s12 + $0x1] sm:$0x1] %v3307_v18 }
 0x290   : > { %5361 = shalt.err (!%p5358_p0)
}
 0x291   : > { %s5362_s23 = scalar_lea.hbm %s6450_s27, 32  ;;  %s5366_s13 = scalar_lea.hbm %s6499_s5, 64 }
 0x292   : > { %p5363_p5 = scmp.ne.s32.totalorder %s6450_s27, %s5362_s23  ;;  %p5367_p4 = scmp.lt.u32.totalorder %s6450_s27, %s6499_s5 }
 0x293   : > { %p5368_p6 = scmp.lt.u32.totalorder %s5366_s13, %s5362_s23  ;;  %p5370_p10 = scmp.lt.u32.totalorder %s5362_s23, %s6450_s27 }
 0x294   : > { %p5364_p11 = pnand %p5363_p5, %p5557_p12 }
 0x295   : > { %p5369_p8 = por %p5368_p6, %p5367_p4 }
 0x296   : > { %p5365_p2 = pneg %p5364_p11 }
 0x297   : > { %p5371_p13 = por %p5370_p10, %p5369_p8 }
 0x299   : > { %p5372_p3 = pnand %p5371_p13, %p5365_p2 }
 0x29b   : > { %5375 = shalt.err (!%p5372_p3)
}
 0x29c   : > { %5198 = dma.vmem_to_hbm [thread:$0]  (%p5557_p12), %s6452_s7, 32, %s6450_s27, %s3315_s24  }
 0x29d PF: > { %s3356_s11 = sand.u32 1, %s5410_s18   ;;  %p6577_p7 = scmp.ne.s32.totalorder %s6529_s25, 0 }
 0x29e   : > { %p6578_p9 = scmp.ge.s32.totalorder %s5422_s21, 2  ;;  %s3357_s12 = scalar_lea.sflag [#allocation5], %s3356_s11 }
 0x2a0   : > { %p5210_p1 = pnand %p6578_p9, %p6577_p7 }
 0x2a2   : > { %5401 = dma.done.wait (!%p5210_p1), %s3357_s12, 4096  }
 0x2a3   : > { %5403 = vsyncadd (!%p5210_p1), %s3357_s12, 4294963200  ;;  %s3366_s15 = scalar_lea.sflag [#allocation10], %s3356_s11 }
 0x2a4   : > { %5405 = dma.done.wait (!%p5210_p1), %s3366_s15, 32  }
 0x2a5   : > { %5407 = vsyncadd (!%p5210_p1), %s3366_s15, 4294967264  ;;  %p23_p12 = scmp.ge.s32.totalorder %s5519_s30, 4   ;;  %s6579_s18 = smov %s5414_s19 }
 0x2a6   : > { %s6580_s19 = smov %s5418_s20  ;;  %s6581_s20 = smov %s5553_s8 }
 0x2a7   : > { %s6582_s21 = smov %s5519_s30  ;;  %25 = sbr.rel (!%p23_p12) target bundleno = 8 (0x8), region = 105 }
 0x2ae   :  { %3371 = vsyncpa [#allocation4], 1 }
 0x2af   :  { %3373 = vsyncpa [#allocation4 + $0x1], 1 }
 0x2b0   :  { %3374 = vsyncpa [#allocation7], 1 }
 0x2b1   :  { %3375 = vsyncpa [#allocation5], 1 }
 0x2b2   :  { %3377 = vsyncpa [#allocation5 + $0x1], 1 }
 0x2b3   :  { %3378 = vsyncpa [#allocation10], 1 }
 0x2b4   :  { %3380 = vsyncpa [#allocation10 + $0x1], 1 }

</bundles_post_ra>
